<compile_context>
chip_gen: v6e
topology: v6e:2x2x1
jax: 0.10.0
libtpu: 0.0.40
codegen_flags: <defaults>
</compile_context>

<pallas_src>
import functools

import jax
import jax.numpy as jnp
from jax.experimental import pallas as pl
from jax.experimental.pallas import tpu as pltpu


def _round_up(x, m):
    return ((x + m - 1) // m) * m


def _largest_divisor_group(T, ci, co, mxu_lanes=256):
    """Largest divisor g of T with g*max(ci,co) <= mxu_lanes (>=1)."""
    width = max(ci, co)
    for g in range(T, 0, -1):
        if T % g == 0 and g * width <= mxu_lanes:
            return g
    return 1


# ---------------------------------------------------------------------------
# Fused Pallas kernel: full ChebNetGCN stack for one packed batch group.
#   activations live in the [R, T*C] layout (R = G*N rows, lane = (t, c));
#   Chebyshev transform: X_k = T_k(L) @ X   (basis precomputed once per step)
#   projection:          per 128/256-lane chunk, X_k_chunk @ W_k (+ bias)
# ---------------------------------------------------------------------------
def _gcn_stack_kernel(lap_ref, x_ref, w_in_ref, b_in_ref, *rest,
                      num_hidden, K, T, c_in, hidden_size,
                      g_in, g_hid, g_out, residual, use_bf16):
    if num_hidden > 0:
        w_hid_ref, b_hid_ref, w_out_ref, b_out_ref, o_ref = rest
    else:
        w_out_ref, b_out_ref, o_ref = rest

    f32 = jnp.float32
    lap = lap_ref[...].astype(f32)                          # [R, R]
    R = lap.shape[0]

    def to_mx(a):                                           # MXU feed dtype
        return a.astype(jnp.bfloat16) if use_bf16 else a

    # --- Chebyshev basis T_k(L), k = 1..K-1, computed once, reused per layer
    basis = []
    if K > 1:
        basis.append(lap)
        if K > 2:
            rows = jax.lax.broadcasted_iota(jnp.int32, (R, R), 0)
            cols = jax.lax.broadcasted_iota(jnp.int32, (R, R), 1)
            eye = jnp.where(rows == cols, 1.0, 0.0).astype(f32)
            tkm2, tkm1 = eye, lap
            for _ in range(2, K):
                tk = 2.0 * jnp.dot(lap, tkm1, preferred_element_type=f32) - tkm2
                basis.append(tk)
                tkm2, tkm1 = tkm1, tk
    basis_mx = [to_mx(b) for b in basis]                    # cast once (bf16)

    def cheb_layer(act, w_of_k, bias, ci, g, relu):
        # act:      [R, >= T*ci] f32 (any extra lanes are zero padding)
        # w_of_k(k): [g*ci, wo]  capped block-diag weight (shared by chunks)
        # bias:     [1, wo]
        act_mx = to_mx(act)
        xs = [act_mx]                                       # T_0(L) x = x
        for k in range(1, K):
            xk = jnp.dot(basis_mx[k - 1], act_mx, preferred_element_type=f32)
            xs.append(to_mx(xk))
        ws = [to_mx(w_of_k(k)) for k in range(K)]           # load each W_k once
        wi = g * ci
        outs = []
        for j in range(T // g):                             # static lane chunks
            acc = jnp.dot(xs[0][:, j * wi:(j + 1) * wi], ws[0],
                          preferred_element_type=f32)
            for k in range(1, K):
                acc += jnp.dot(xs[k][:, j * wi:(j + 1) * wi], ws[k],
                               preferred_element_type=f32)
            acc += bias
            if relu:
                acc = jnp.maximum(acc, 0.0)
            outs.append(acc)
        return outs[0] if len(outs) == 1 else jnp.concatenate(outs, axis=-1)

    # ---- input conv + ReLU --------------------------------------------------
    act = cheb_layer(x_ref[...].astype(f32), lambda k: w_in_ref[k],
                     b_in_ref[...].astype(f32), c_in, g_in, relu=True)

    # ---- hidden convs ---------------------------------------------------------
    if num_hidden >= 2:
        # fori_loop keeps only one layer's temporaries live (vreg pressure).
        def body(l, a):
            bias = b_hid_ref[l].astype(f32)                 # [1, wo]
            h = cheb_layer(a, lambda k: w_hid_ref[l * K + k], bias,
                           hidden_size, g_hid, relu=True)
            return h + a if residual else h
        act = jax.lax.fori_loop(0, num_hidden, body, act)
    else:
        for l in range(num_hidden):
            bias = b_hid_ref[l].astype(f32)
            h = cheb_layer(act, lambda k, l=l: w_hid_ref[l * K + k], bias,
                           hidden_size, g_hid, relu=True)
            act = h + act if residual else h

    # ---- output conv (lane-dense padded store) -------------------------------
    out = cheb_layer(act, lambda k: w_out_ref[k],
                     b_out_ref[...].astype(f32), hidden_size, g_out, relu=False)
    o_ref[...] = out.astype(o_ref.dtype)


# ---------------------------------------------------------------------------
# Forward wrapper: host-side layout prep + one pallas_call for the whole stack
# ---------------------------------------------------------------------------
def chebnet_gcn_forward(params, x, laplacian, residual=False,
                        use_bf16_matmul=False, mxu_lanes=256):
    """Forward pass of ChebNetGCN (eval mode; F.dropout is identity).

    x:         [B, T, N, C_in] float32
    laplacian: [B, N, N]       float32
    returns    [B, T, N, C_out] float32
    """
    K = params["k"]
    B, T, N, C_in = x.shape
    w_in, b_in = params["input"]
    hidden = params["hidden"]
    w_out, b_out = params["output"]
    H = w_in.shape[1]
    C_out = w_out.shape[1]
    num_hidden = len(hidden)

    # ---- batch packing: G elements per grid step (block-diag Laplacian) ------
    g_pack = max(1, 128 // N) if N < 128 else 1
    g_pack = min(g_pack, B)
    if B >= 2:                               # keep >=2 grid steps (v7x 2 TCs)
        g_pack = min(g_pack, max(1, B // 2))
    n_groups = -(-B // g_pack)
    B_pad = n_groups * g_pack
    R = g_pack * N

    lap = laplacian
    if B_pad > B:
        lap = jnp.pad(lap, ((0, B_pad - B), (0, 0), (0, 0)))
        x = jnp.pad(x, ((0, B_pad - B), (0, 0), (0, 0), (0, 0)))
    if g_pack > 1:
        lap_r = lap.reshape(n_groups, g_pack, N, N)
        eye_g = jnp.eye(g_pack, dtype=lap.dtype)
        lap_grp = jnp.einsum("gh,bgij->bgihj", eye_g, lap_r)
        lap_grp = lap_grp.reshape(n_groups, R, R)
    else:
        lap_grp = lap

    # activations enter as [R, T*C_in] (lane = t*C_in + c); pad lanes to >=128
    in_lanes = max(T * C_in, 128)
    xp = x.reshape(n_groups, g_pack, T, N, C_in)
    xp = jnp.transpose(xp, (0, 1, 3, 2, 4)).reshape(n_groups, R, T * C_in)
    if in_lanes > T * C_in:
        xp = jnp.pad(xp, ((0, 0), (0, 0), (0, in_lanes - T * C_in)))

    # ---- capped block-diagonal weight expansion (I_g (x) W_k) ----------------
    g_in = _largest_divisor_group(T, C_in, H, mxu_lanes)
    g_hid = _largest_divisor_group(T, H, H, mxu_lanes)
    g_out = _largest_divisor_group(T, H, C_out, mxu_lanes)
    wo_out_pad = _round_up(g_out * C_out, 128)      # lane-dense final store
    out_lanes = (T // g_out) * wo_out_pad

    w_dtype = jnp.bfloat16 if use_bf16_matmul else jnp.float32

    def expand(w, ci, co, g, pad_to=None):
        wk = w.reshape(K, ci, co).astype(jnp.float32)
        blk = jnp.einsum("ts,kco->ktcso", jnp.eye(g, dtype=jnp.float32), wk)
        blk = blk.reshape(K, g * ci, g * co)
        if pad_to is not None and pad_to > g * co:
            blk = jnp.pad(blk, ((0, 0), (0, 0), (0, pad_to - g * co)))
        return blk.astype(w_dtype)           # bf16 host-cast halves weight DMA

    def tile_bias(b, co, g, pad_to=None):
        bt = jnp.tile(b.reshape(1, co).astype(jnp.float32), (1, g))
        if pad_to is not None and pad_to > g * co:
            bt = jnp.pad(bt, ((0, 0), (0, pad_to - g * co)))
        return bt                            # biases stay f32 (f32 accumulate)

    w_in_blk = expand(w_in, C_in, H, g_in)                     # [K, gCi, gH]
    b_in_t = tile_bias(b_in, H, g_in)                          # [1, gH]
    w_out_blk = expand(w_out, H, C_out, g_out, pad_to=wo_out_pad)
    b_out_t = tile_bias(b_out, C_out, g_out, pad_to=wo_out_pad)

    operands = [lap_grp, xp, w_in_blk, b_in_t]
    if num_hidden > 0:
        w_hid_blk = jnp.concatenate(
            [expand(w, H, H, g_hid) for (w, _) in hidden], axis=0)  # [L*K,.,.]
        b_hid_t = jnp.stack([tile_bias(b, H, g_hid) for (_, b) in hidden], 0)
        operands += [w_hid_blk, b_hid_t]
    operands += [w_out_blk, b_out_t]

    # ---- advisory cost estimate ----------------------------------------------
    def layer_flops(lanes_in, ci, g, wo):
        cheb = (K - 1) * 2 * R * R * lanes_in
        proj = K * (T // g) * 2 * R * (g * ci) * wo
        return cheb + proj
    basis_flops = max(0, K - 2) * 2 * R ** 3
    flops = n_groups * (basis_flops
                        + layer_flops(in_lanes, C_in, g_in, g_in * H)
                        + num_hidden * layer_flops(T * H, H, g_hid, g_hid * H)
                        + layer_flops(T * H, H, g_out, wo_out_pad))
    bytes_accessed = (sum(int(a.size) * a.dtype.itemsize for a in operands)
                      + n_groups * R * out_lanes * x.dtype.itemsize)

    # ---- explicit VMEM budget (weights single-buffered, I/O double-buffered) -
    w_bytes = sum(int(a.size) * a.dtype.itemsize for a in operands[2:])
    io_bytes = 2 * 4 * (R * R + R * in_lanes + R * out_lanes)
    act_lanes = max(in_lanes, T * H, out_lanes)
    act_bytes = (K + 4) * 4 * R * act_lanes + (K + 1) * 4 * R * R
    needed = io_bytes + w_bytes + act_bytes
    vmem_limit = int(min(112 << 20, max(32 << 20, 2 * needed + (8 << 20))))

    kernel = functools.partial(
        _gcn_stack_kernel, num_hidden=num_hidden, K=K, T=T, c_in=C_in,
        hidden_size=H, g_in=g_in, g_hid=g_hid, g_out=g_out,
        residual=residual, use_bf16=use_bf16_matmul)

    lap_spec = pl.BlockSpec((None, R, R), lambda b: (b, 0, 0))
    x_spec = pl.BlockSpec((None, R, in_lanes), lambda b: (b, 0, 0))
    out_spec = pl.BlockSpec((None, R, out_lanes), lambda b: (b, 0, 0))

    def build(single_buffer_weights):
        def wspec(shape):
            idx = (lambda b: (0, 0)) if len(shape) == 2 else (lambda b: (0, 0, 0))
            if single_buffer_weights:
                # constant index_map => no benefit from double buffering
                return pl.BlockSpec(shape, idx, pipeline_mode=pl.Buffered(1))
            return pl.BlockSpec(shape, idx)

        in_specs = [lap_spec, x_spec,
                    wspec((K, g_in * C_in, g_in * H)),
                    wspec((1, g_in * H))]
        if num_hidden > 0:
            in_specs += [wspec((num_hidden * K, g_hid * H, g_hid * H)),
                         wspec((num_hidden, 1, g_hid * H))]
        in_specs += [wspec((K, g_out * H, wo_out_pad)),
                     wspec((1, wo_out_pad))]
        return pl.pallas_call(
            kernel,
            out_shape=jax.ShapeDtypeStruct((n_groups, R, out_lanes), x.dtype),
            grid=(n_groups,),
            in_specs=in_specs,
            out_specs=out_spec,
            compiler_params=pltpu.CompilerParams(
                dimension_semantics=("parallel",),
                vmem_limit_bytes=vmem_limit),
            cost_estimate=pl.CostEstimate(flops=int(flops), transcendentals=0,
                                          bytes_accessed=int(bytes_accessed)),
        )

    try:
        out_padded = build(True)(*operands)
    except Exception:
        # Fallback for jax versions where Buffered(1) single-buffering on a
        # BlockSpec is not supported; identical math, default buffering.
        out_padded = build(False)(*operands)

    # [n_groups, R, out_lanes] -> strip per-chunk lane padding -> [B, T, N, Co]
    out = out_padded.reshape(n_groups, g_pack, N, T // g_out, wo_out_pad)
    out = out[..., :g_out * C_out]
    out = out.reshape(n_groups, g_pack, N, T, C_out)
    out = jnp.transpose(out, (0, 1, 3, 2, 4)).reshape(B_pad, T, N, C_out)
    # TODO(synk): dropout (p=0.1) is identity at inference; CrossEntropyLoss
    # branch (labels is not None) is not implemented -- logits only.
    return out[:B]


# ---------------------------------------------------------------------------
# Parameter init (deterministic nn.Linear-style)
# ---------------------------------------------------------------------------
def init_linear(key, fan_in, fan_out):
    kw, kb = jax.random.split(key)
    bound = 1.0 / jnp.sqrt(jnp.float32(fan_in))
    w = jax.random.uniform(kw, (fan_in, fan_out), jnp.float32, -bound, bound)
    b = jax.random.uniform(kb, (1, fan_out), jnp.float32, -bound, bound)
    return w, b


def init_chebnet_gcn(key, input_size, hidden_size, output_size,
                     num_hidden_layers=0, k=2):
    keys = jax.random.split(key, 2 + num_hidden_layers)
    return {
        "input": init_linear(keys[0], input_size * k, hidden_size),
        "hidden": [init_linear(keys[1 + i], hidden_size * k, hidden_size)
                   for i in range(num_hidden_layers)],
        "output": init_linear(keys[1 + num_hidden_layers],
                              hidden_size * k, output_size),
        "k": k,
    }


# ---------------------------------------------------------------------------
# Pure-JAX reference (mirrors the PyTorch einsum/concat/linear exactly)
# ---------------------------------------------------------------------------
_HI = jax.lax.Precision.HIGHEST


def _ref_conv(x, lap, w, b, K, relu):
    cheb = [x]
    x0 = x
    if K > 1:
        x1 = jnp.einsum("bnm,btmc->btnc", lap, x0, precision=_HI)
        cheb.append(x1)
        for _ in range(2, K):
            x2 = 2.0 * jnp.einsum("bnm,btmc->btnc", lap, x1, precision=_HI) - x0
            cheb.append(x2)
            x0, x1 = x1, x2
    cat = jnp.concatenate(cheb, axis=-1)
    out = jnp.einsum("btnf,fo->btno", cat, w, precision=_HI) + b[0]
    return jnp.maximum(out, 0.0) if relu else out


def _ref_forward(params, x, lap, residual=False):
    k = params["k"]
    w, b = params["input"]
    x = _ref_conv(x, lap, w, b, k, True)
    for (w, b) in params["hidden"]:
        h = _ref_conv(x, lap, w, b, k, True)
        x = h + x if residual else h
    w, b = params["output"]
    return _ref_conv(x, lap, w, b, k, False)


if __name__ == "__main__":
    master_key = jax.random.PRNGKey(0)

    def run_case(name, B, T, N, c_in, hid, c_out, k, n_hid, residual, tol, key):
        kx, kl, kp = jax.random.split(key, 3)
        x = jax.random.normal(kx, (B, T, N, c_in), jnp.float32)
        a = jax.random.normal(kl, (B, N, N), jnp.float32) * 0.1
        lap = 0.5 * (a + jnp.swapaxes(a, -1, -2))      # symmetric, finite
        params = init_chebnet_gcn(kp, c_in, hid, c_out, n_hid, k)
        out = jax.block_until_ready(
            chebnet_gcn_forward(params, x, lap, residual=residual))
        ref = _ref_forward(params, x, lap, residual=residual)
        assert out.shape == (B, T, N, c_out), f"{name}: bad shape {out.shape}"
        err = float(jnp.max(jnp.abs(out - ref)))
        assert jnp.allclose(out, ref, atol=tol, rtol=tol), \
            f"{name}: max abs err {err}"

    # config 1: baseline small shapes (K=2, one hidden layer), +/- residual
    k1 = jax.random.fold_in(master_key, 1)
    for residual in (False, True):
        run_case("cfg1", B=2, T=8, N=16, c_in=4, hid=32, c_out=8,
                 k=2, n_hid=1, residual=residual, tol=2e-4, key=k1)

    # config 2: exercises batch packing (G=2) + batch padding, K=3 basis
    #           precompute, fori_loop hidden layers, chunked projection
    #           (T*H = 512 > 256 lanes) and padded output chunks.
    k2 = jax.random.fold_in(master_key, 2)
    run_case("cfg2", B=5, T=8, N=16, c_in=4, hid=64, c_out=8,
             k=3, n_hid=2, residual=True, tol=5e-4, key=k2)

    # bf16 MXU-feed path (opt-in, not bit-exact): compile/run sanity check only
    k3 = jax.random.fold_in(master_key, 3)
    kx, kl, kp = jax.random.split(k3, 3)
    xb = jax.random.normal(kx, (2, 8, 16, 4), jnp.float32)
    ab = jax.random.normal(kl, (2, 16, 16), jnp.float32) * 0.1
    lapb = 0.5 * (ab + jnp.swapaxes(ab, -1, -2))
    pb = init_chebnet_gcn(kp, 4, 32, 8, 1, 2)
    out_bf16 = jax.block_until_ready(
        chebnet_gcn_forward(pb, xb, lapb, use_bf16_matmul=True))
    assert out_bf16.shape == (2, 8, 16, 8)
    assert bool(jnp.isfinite(out_bf16).all())

    print("KERNEL_OK")
</pallas_src>

<mosaic_0001>
module attributes {stable_mosaic.version = 11 : i64} {
  func.func @_gcn_stack_kernel(%arg0: i32, %arg1: memref<1x16x16xf32, #tpu.memory_space<vmem>>, %arg2: memref<1x16x128xf32, #tpu.memory_space<vmem>>, %arg3: memref<2x32x256xf32, #tpu.memory_space<vmem>>, %arg4: memref<1x256xf32, #tpu.memory_space<vmem>>, %arg5: memref<2x256x256xf32, #tpu.memory_space<vmem>>, %arg6: memref<1x1x256xf32, #tpu.memory_space<vmem>>, %arg7: memref<2x256x128xf32, #tpu.memory_space<vmem>>, %arg8: memref<1x128xf32, #tpu.memory_space<vmem>>, %arg9: memref<1x16x128xf32, #tpu.memory_space<vmem>>) attributes {dimension_semantics = [#tpu.dimension_semantics<parallel>], iteration_bounds = array<i64: 2>, scalar_prefetch = 0 : i64, scratch_operands = 0 : i64, tpu.core_type = #tpu.core_type<tc>, window_params = [{transform_indices = @transform_0, window_bounds = array<i64: 1, 16, 16>}, {transform_indices = @transform_1, window_bounds = array<i64: 1, 16, 128>}, {pipeline_mode = #tpu.pipeline_mode<synchronous>, transform_indices = @transform_2, window_bounds = array<i64: 2, 32, 256>}, {pipeline_mode = #tpu.pipeline_mode<synchronous>, transform_indices = @transform_3, window_bounds = array<i64: 1, 256>}, {pipeline_mode = #tpu.pipeline_mode<synchronous>, transform_indices = @transform_4, window_bounds = array<i64: 2, 256, 256>}, {pipeline_mode = #tpu.pipeline_mode<synchronous>, transform_indices = @transform_5, window_bounds = array<i64: 1, 1, 256>}, {pipeline_mode = #tpu.pipeline_mode<synchronous>, transform_indices = @transform_6, window_bounds = array<i64: 2, 256, 128>}, {pipeline_mode = #tpu.pipeline_mode<synchronous>, transform_indices = @transform_7, window_bounds = array<i64: 1, 128>}, {transform_indices = @transform_8, window_bounds = array<i64: 1, 16, 128>}]} {
    %c0 = arith.constant 0 : index
    %c0_0 = arith.constant 0 : index
    %c0_1 = arith.constant 0 : index
    %0 = vector.load %arg1[%c0, %c0_0, %c0_1] : memref<1x16x16xf32, #tpu.memory_space<vmem>>, vector<1x16x16xf32>
    %1 = vector.shape_cast %0 : vector<1x16x16xf32> to vector<16x16xf32>
    %c0_2 = arith.constant 0 : index
    %c0_3 = arith.constant 0 : index
    %c0_4 = arith.constant 0 : index
    %2 = vector.load %arg2[%c0_2, %c0_3, %c0_4] : memref<1x16x128xf32, #tpu.memory_space<vmem>>, vector<1x16x128xf32>
    %3 = vector.shape_cast %2 : vector<1x16x128xf32> to vector<16x128xf32>
    %c0_5 = arith.constant 0 : index
    %c0_6 = arith.constant 0 : index
    %4 = vector.load %arg4[%c0_5, %c0_6] : memref<1x256xf32, #tpu.memory_space<vmem>>, vector<1x256xf32>
    %cst = arith.constant dense<0.000000e+00> : vector<16x128xf32>
    %5 = tpu.matmul %1, %3, %cst {dimension_numbers = #tpu.dot_dimension_numbers<[1], [0], [0], [1], [0, 0, 1, 1], [], []>} : vector<16x16xf32>, vector<16x128xf32>, vector<16x128xf32> -> vector<16x128xf32>
    %c0_7 = arith.constant 0 : index
    %c0_8 = arith.constant 0 : index
    %c0_9 = arith.constant 0 : index
    %6 = vector.load %arg3[%c0_7, %c0_8, %c0_9] : memref<2x32x256xf32, #tpu.memory_space<vmem>>, vector<1x32x256xf32>
    %7 = vector.shape_cast %6 : vector<1x32x256xf32> to vector<32x256xf32>
    %c1 = arith.constant 1 : index
    %c0_10 = arith.constant 0 : index
    %c0_11 = arith.constant 0 : index
    %8 = vector.load %arg3[%c1, %c0_10, %c0_11] : memref<2x32x256xf32, #tpu.memory_space<vmem>>, vector<1x32x256xf32>
    %9 = vector.shape_cast %8 : vector<1x32x256xf32> to vector<32x256xf32>
    %10 = vector.extract_strided_slice %3 {offsets = [0, 0], sizes = [16, 32], strides = [1, 1]} : vector<16x128xf32> to vector<16x32xf32>
    %cst_12 = arith.constant dense<0.000000e+00> : vector<16x256xf32>
    %11 = tpu.matmul %10, %7, %cst_12 {dimension_numbers = #tpu.dot_dimension_numbers<[1], [0], [0], [1], [0, 0, 1, 1], [], []>} : vector<16x32xf32>, vector<32x256xf32>, vector<16x256xf32> -> vector<16x256xf32>
    %12 = vector.extract_strided_slice %5 {offsets = [0, 0], sizes = [16, 32], strides = [1, 1]} : vector<16x128xf32> to vector<16x32xf32>
    %cst_13 = arith.constant dense<0.000000e+00> : vector<16x256xf32>
    %13 = tpu.matmul %12, %9, %cst_13 {dimension_numbers = #tpu.dot_dimension_numbers<[1], [0], [0], [1], [0, 0, 1, 1], [], []>} : vector<16x32xf32>, vector<32x256xf32>, vector<16x256xf32> -> vector<16x256xf32>
    %14 = arith.addf %11, %13 : vector<16x256xf32>
    %15 = vector.broadcast %4 : vector<1x256xf32> to vector<16x256xf32>
    %16 = arith.addf %14, %15 : vector<16x256xf32>
    %cst_14 = arith.constant 0.000000e+00 : f32
    %17 = vector.broadcast %cst_14 : f32 to vector<16x256xf32>
    %18 = arith.maximumf %16, %17 : vector<16x256xf32>
    %c0_15 = arith.constant 0 : index
    %c0_16 = arith.constant 0 : index
    %c0_17 = arith.constant 0 : index
    %19 = vector.load %arg6[%c0_15, %c0_16, %c0_17] : memref<1x1x256xf32, #tpu.memory_space<vmem>>, vector<1x1x256xf32>
    %20 = vector.shape_cast %19 : vector<1x1x256xf32> to vector<1x256xf32>
    %cst_18 = arith.constant dense<0.000000e+00> : vector<16x256xf32>
    %21 = tpu.matmul %1, %18, %cst_18 {dimension_numbers = #tpu.dot_dimension_numbers<[1], [0], [0], [1], [0, 0, 1, 1], [], []>} : vector<16x16xf32>, vector<16x256xf32>, vector<16x256xf32> -> vector<16x256xf32>
    %c0_19 = arith.constant 0 : index
    %c0_20 = arith.constant 0 : index
    %c0_21 = arith.constant 0 : index
    %22 = vector.load %arg5[%c0_19, %c0_20, %c0_21] : memref<2x256x256xf32, #tpu.memory_space<vmem>>, vector<1x256x256xf32>
    %23 = vector.shape_cast %22 : vector<1x256x256xf32> to vector<256x256xf32>
    %c1_22 = arith.constant 1 : index
    %c0_23 = arith.constant 0 : index
    %c0_24 = arith.constant 0 : index
    %24 = vector.load %arg5[%c1_22, %c0_23, %c0_24] : memref<2x256x256xf32, #tpu.memory_space<vmem>>, vector<1x256x256xf32>
    %25 = vector.shape_cast %24 : vector<1x256x256xf32> to vector<256x256xf32>
    %cst_25 = arith.constant dense<0.000000e+00> : vector<16x256xf32>
    %26 = tpu.matmul %18, %23, %cst_25 {dimension_numbers = #tpu.dot_dimension_numbers<[1], [0], [0], [1], [0, 0, 1, 1], [], []>} : vector<16x256xf32>, vector<256x256xf32>, vector<16x256xf32> -> vector<16x256xf32>
    %cst_26 = arith.constant dense<0.000000e+00> : vector<16x256xf32>
    %27 = tpu.matmul %21, %25, %cst_26 {dimension_numbers = #tpu.dot_dimension_numbers<[1], [0], [0], [1], [0, 0, 1, 1], [], []>} : vector<16x256xf32>, vector<256x256xf32>, vector<16x256xf32> -> vector<16x256xf32>
    %28 = arith.addf %26, %27 : vector<16x256xf32>
    %29 = vector.broadcast %20 : vector<1x256xf32> to vector<16x256xf32>
    %30 = arith.addf %28, %29 : vector<16x256xf32>
    %cst_27 = arith.constant 0.000000e+00 : f32
    %31 = vector.broadcast %cst_27 : f32 to vector<16x256xf32>
    %32 = arith.maximumf %30, %31 : vector<16x256xf32>
    %c0_28 = arith.constant 0 : index
    %c0_29 = arith.constant 0 : index
    %33 = vector.load %arg8[%c0_28, %c0_29] : memref<1x128xf32, #tpu.memory_space<vmem>>, vector<1x128xf32>
    %cst_30 = arith.constant dense<0.000000e+00> : vector<16x256xf32>
    %34 = tpu.matmul %1, %32, %cst_30 {dimension_numbers = #tpu.dot_dimension_numbers<[1], [0], [0], [1], [0, 0, 1, 1], [], []>} : vector<16x16xf32>, vector<16x256xf32>, vector<16x256xf32> -> vector<16x256xf32>
    %c0_31 = arith.constant 0 : index
    %c0_32 = arith.constant 0 : index
    %c0_33 = arith.constant 0 : index
    %35 = vector.load %arg7[%c0_31, %c0_32, %c0_33] : memref<2x256x128xf32, #tpu.memory_space<vmem>>, vector<1x256x128xf32>
    %36 = vector.shape_cast %35 : vector<1x256x128xf32> to vector<256x128xf32>
    %c1_34 = arith.constant 1 : index
    %c0_35 = arith.constant 0 : index
    %c0_36 = arith.constant 0 : index
    %37 = vector.load %arg7[%c1_34, %c0_35, %c0_36] : memref<2x256x128xf32, #tpu.memory_space<vmem>>, vector<1x256x128xf32>
    %38 = vector.shape_cast %37 : vector<1x256x128xf32> to vector<256x128xf32>
    %cst_37 = arith.constant dense<0.000000e+00> : vector<16x128xf32>
    %39 = tpu.matmul %32, %36, %cst_37 {dimension_numbers = #tpu.dot_dimension_numbers<[1], [0], [0], [1], [0, 0, 1, 1], [], []>} : vector<16x256xf32>, vector<256x128xf32>, vector<16x128xf32> -> vector<16x128xf32>
    %cst_38 = arith.constant dense<0.000000e+00> : vector<16x128xf32>
    %40 = tpu.matmul %34, %38, %cst_38 {dimension_numbers = #tpu.dot_dimension_numbers<[1], [0], [0], [1], [0, 0, 1, 1], [], []>} : vector<16x256xf32>, vector<256x128xf32>, vector<16x128xf32> -> vector<16x128xf32>
    %41 = arith.addf %39, %40 : vector<16x128xf32>
    %42 = vector.broadcast %33 : vector<1x128xf32> to vector<16x128xf32>
    %43 = arith.addf %41, %42 : vector<16x128xf32>
    %c0_39 = arith.constant 0 : index
    %c0_40 = arith.constant 0 : index
    %c0_41 = arith.constant 0 : index
    %44 = vector.load %arg9[%c0_39, %c0_40, %c0_41] : memref<1x16x128xf32, #tpu.memory_space<vmem>>, vector<1x16x128xf32>
    %45 = vector.shape_cast %44 : vector<1x16x128xf32> to vector<16x128xf32>
    %46 = vector.shape_cast %43 : vector<16x128xf32> to vector<1x16x128xf32>
    tpu.vector_store %arg9[%c0_39, %c0_40, %c0_41], %46 {strides = array<i32>} : memref<1x16x128xf32, #tpu.memory_space<vmem>>, vector<1x16x128xf32>,
    return
  }
  func.func @transform_0(%arg0: i32) -> (i32, i32, i32) {
    %c0_i32 = arith.constant 0 : i32
    %c0_i32_0 = arith.constant 0 : i32
    %c0_i32_1 = arith.constant 0 : i32
    return %arg0, %c0_i32, %c0_i32_0 : i32, i32, i32
  }
  func.func @transform_1(%arg0: i32) -> (i32, i32, i32) {
    %c0_i32 = arith.constant 0 : i32
    %c0_i32_0 = arith.constant 0 : i32
    %c0_i32_1 = arith.constant 0 : i32
    return %arg0, %c0_i32, %c0_i32_0 : i32, i32, i32
  }
  func.func @transform_2(%arg0: i32) -> (i32, i32, i32) {
    %c0_i32 = arith.constant 0 : i32
    %c0_i32_0 = arith.constant 0 : i32
    %c0_i32_1 = arith.constant 0 : i32
    %c0_i32_2 = arith.constant 0 : i32
    return %c0_i32, %c0_i32_0, %c0_i32_1 : i32, i32, i32
  }
  func.func @transform_3(%arg0: i32) -> (i32, i32) {
    %c0_i32 = arith.constant 0 : i32
    %c0_i32_0 = arith.constant 0 : i32
    %c0_i32_1 = arith.constant 0 : i32
    return %c0_i32, %c0_i32_0 : i32, i32
  }
  func.func @transform_4(%arg0: i32) -> (i32, i32, i32) {
    %c0_i32 = arith.constant 0 : i32
    %c0_i32_0 = arith.constant 0 : i32
    %c0_i32_1 = arith.constant 0 : i32
    %c0_i32_2 = arith.constant 0 : i32
    return %c0_i32, %c0_i32_0, %c0_i32_1 : i32, i32, i32
  }
  func.func @transform_5(%arg0: i32) -> (i32, i32, i32) {
    %c0_i32 = arith.constant 0 : i32
    %c0_i32_0 = arith.constant 0 : i32
    %c0_i32_1 = arith.constant 0 : i32
    %c0_i32_2 = arith.constant 0 : i32
    return %c0_i32, %c0_i32_0, %c0_i32_1 : i32, i32, i32
  }
  func.func @transform_6(%arg0: i32) -> (i32, i32, i32) {
    %c0_i32 = arith.constant 0 : i32
    %c0_i32_0 = arith.constant 0 : i32
    %c0_i32_1 = arith.constant 0 : i32
    %c0_i32_2 = arith.constant 0 : i32
    return %c0_i32, %c0_i32_0, %c0_i32_1 : i32, i32, i32
  }
  func.func @transform_7(%arg0: i32) -> (i32, i32) {
    %c0_i32 = arith.constant 0 : i32
    %c0_i32_0 = arith.constant 0 : i32
    %c0_i32_1 = arith.constant 0 : i32
    return %c0_i32, %c0_i32_0 : i32, i32
  }
  func.func @transform_8(%arg0: i32) -> (i32, i32, i32) {
    %c0_i32 = arith.constant 0 : i32
    %c0_i32_0 = arith.constant 0 : i32
    %c0_i32_1 = arith.constant 0 : i32
    return %arg0, %c0_i32, %c0_i32_0 : i32, i32, i32
  }
}

module attributes {stable_mosaic.version = 11 : i64} {
  func.func @_gcn_stack_kernel(%arg0: i32, %arg1: memref<1x16x16xf32, #tpu.memory_space<vmem>>, %arg2: memref<1x16x128xf32, #tpu.memory_space<vmem>>, %arg3: memref<2x32x256xf32, #tpu.memory_space<vmem>>, %arg4: memref<1x256xf32, #tpu.memory_space<vmem>>, %arg5: memref<2x256x256xf32, #tpu.memory_space<vmem>>, %arg6: memref<1x1x256xf32, #tpu.memory_space<vmem>>, %arg7: memref<2x256x128xf32, #tpu.memory_space<vmem>>, %arg8: memref<1x128xf32, #tpu.memory_space<vmem>>, %arg9: memref<1x16x128xf32, #tpu.memory_space<vmem>>) attributes {dimension_semantics = [#tpu.dimension_semantics<parallel>], iteration_bounds = array<i64: 2>, scalar_prefetch = 0 : i64, scratch_operands = 0 : i64, tpu.core_type = #tpu.core_type<tc>, window_params = [{transform_indices = @transform_0, window_bounds = array<i64: 1, 16, 16>}, {transform_indices = @transform_1, window_bounds = array<i64: 1, 16, 128>}, {pipeline_mode = #tpu.pipeline_mode<synchronous>, transform_indices = @transform_2, window_bounds = array<i64: 2, 32, 256>}, {pipeline_mode = #tpu.pipeline_mode<synchronous>, transform_indices = @transform_3, window_bounds = array<i64: 1, 256>}, {pipeline_mode = #tpu.pipeline_mode<synchronous>, transform_indices = @transform_4, window_bounds = array<i64: 2, 256, 256>}, {pipeline_mode = #tpu.pipeline_mode<synchronous>, transform_indices = @transform_5, window_bounds = array<i64: 1, 1, 256>}, {pipeline_mode = #tpu.pipeline_mode<synchronous>, transform_indices = @transform_6, window_bounds = array<i64: 2, 256, 128>}, {pipeline_mode = #tpu.pipeline_mode<synchronous>, transform_indices = @transform_7, window_bounds = array<i64: 1, 128>}, {transform_indices = @transform_8, window_bounds = array<i64: 1, 16, 128>}]} {
    %c0 = arith.constant 0 : index
    %c0_0 = arith.constant 0 : index
    %c0_1 = arith.constant 0 : index
    %0 = vector.load %arg1[%c0, %c0_0, %c0_1] : memref<1x16x16xf32, #tpu.memory_space<vmem>>, vector<1x16x16xf32>
    %1 = vector.shape_cast %0 : vector<1x16x16xf32> to vector<16x16xf32>
    %c0_2 = arith.constant 0 : index
    %c0_3 = arith.constant 0 : index
    %c0_4 = arith.constant 0 : index
    %2 = vector.load %arg2[%c0_2, %c0_3, %c0_4] : memref<1x16x128xf32, #tpu.memory_space<vmem>>, vector<1x16x128xf32>
    %3 = vector.shape_cast %2 : vector<1x16x128xf32> to vector<16x128xf32>
    %c0_5 = arith.constant 0 : index
    %c0_6 = arith.constant 0 : index
    %4 = vector.load %arg4[%c0_5, %c0_6] : memref<1x256xf32, #tpu.memory_space<vmem>>, vector<1x256xf32>
    %cst = arith.constant dense<0.000000e+00> : vector<16x128xf32>
    %5 = tpu.matmul %1, %3, %cst {dimension_numbers = #tpu.dot_dimension_numbers<[1], [0], [0], [1], [0, 0, 1, 1], [], []>} : vector<16x16xf32>, vector<16x128xf32>, vector<16x128xf32> -> vector<16x128xf32>
    %c0_7 = arith.constant 0 : index
    %c0_8 = arith.constant 0 : index
    %c0_9 = arith.constant 0 : index
    %6 = vector.load %arg3[%c0_7, %c0_8, %c0_9] : memref<2x32x256xf32, #tpu.memory_space<vmem>>, vector<1x32x256xf32>
    %7 = vector.shape_cast %6 : vector<1x32x256xf32> to vector<32x256xf32>
    %c1 = arith.constant 1 : index
    %c0_10 = arith.constant 0 : index
    %c0_11 = arith.constant 0 : index
    %8 = vector.load %arg3[%c1, %c0_10, %c0_11] : memref<2x32x256xf32, #tpu.memory_space<vmem>>, vector<1x32x256xf32>
    %9 = vector.shape_cast %8 : vector<1x32x256xf32> to vector<32x256xf32>
    %10 = vector.extract_strided_slice %3 {offsets = [0, 0], sizes = [16, 32], strides = [1, 1]} : vector<16x128xf32> to vector<16x32xf32>
    %cst_12 = arith.constant dense<0.000000e+00> : vector<16x256xf32>
    %11 = tpu.matmul %10, %7, %cst_12 {dimension_numbers = #tpu.dot_dimension_numbers<[1], [0], [0], [1], [0, 0, 1, 1], [], []>} : vector<16x32xf32>, vector<32x256xf32>, vector<16x256xf32> -> vector<16x256xf32>
    %12 = vector.extract_strided_slice %5 {offsets = [0, 0], sizes = [16, 32], strides = [1, 1]} : vector<16x128xf32> to vector<16x32xf32>
    %cst_13 = arith.constant dense<0.000000e+00> : vector<16x256xf32>
    %13 = tpu.matmul %12, %9, %cst_13 {dimension_numbers = #tpu.dot_dimension_numbers<[1], [0], [0], [1], [0, 0, 1, 1], [], []>} : vector<16x32xf32>, vector<32x256xf32>, vector<16x256xf32> -> vector<16x256xf32>
    %14 = arith.addf %11, %13 : vector<16x256xf32>
    %15 = vector.broadcast %4 : vector<1x256xf32> to vector<16x256xf32>
    %16 = arith.addf %14, %15 : vector<16x256xf32>
    %cst_14 = arith.constant 0.000000e+00 : f32
    %17 = vector.broadcast %cst_14 : f32 to vector<16x256xf32>
    %18 = arith.maximumf %16, %17 : vector<16x256xf32>
    %c0_15 = arith.constant 0 : index
    %c0_16 = arith.constant 0 : index
    %c0_17 = arith.constant 0 : index
    %19 = vector.load %arg6[%c0_15, %c0_16, %c0_17] : memref<1x1x256xf32, #tpu.memory_space<vmem>>, vector<1x1x256xf32>
    %20 = vector.shape_cast %19 : vector<1x1x256xf32> to vector<1x256xf32>
    %cst_18 = arith.constant dense<0.000000e+00> : vector<16x256xf32>
    %21 = tpu.matmul %1, %18, %cst_18 {dimension_numbers = #tpu.dot_dimension_numbers<[1], [0], [0], [1], [0, 0, 1, 1], [], []>} : vector<16x16xf32>, vector<16x256xf32>, vector<16x256xf32> -> vector<16x256xf32>
    %c0_19 = arith.constant 0 : index
    %c0_20 = arith.constant 0 : index
    %c0_21 = arith.constant 0 : index
    %22 = vector.load %arg5[%c0_19, %c0_20, %c0_21] : memref<2x256x256xf32, #tpu.memory_space<vmem>>, vector<1x256x256xf32>
    %23 = vector.shape_cast %22 : vector<1x256x256xf32> to vector<256x256xf32>
    %c1_22 = arith.constant 1 : index
    %c0_23 = arith.constant 0 : index
    %c0_24 = arith.constant 0 : index
    %24 = vector.load %arg5[%c1_22, %c0_23, %c0_24] : memref<2x256x256xf32, #tpu.memory_space<vmem>>, vector<1x256x256xf32>
    %25 = vector.shape_cast %24 : vector<1x256x256xf32> to vector<256x256xf32>
    %cst_25 = arith.constant dense<0.000000e+00> : vector<16x256xf32>
    %26 = tpu.matmul %18, %23, %cst_25 {dimension_numbers = #tpu.dot_dimension_numbers<[1], [0], [0], [1], [0, 0, 1, 1], [], []>} : vector<16x256xf32>, vector<256x256xf32>, vector<16x256xf32> -> vector<16x256xf32>
    %cst_26 = arith.constant dense<0.000000e+00> : vector<16x256xf32>
    %27 = tpu.matmul %21, %25, %cst_26 {dimension_numbers = #tpu.dot_dimension_numbers<[1], [0], [0], [1], [0, 0, 1, 1], [], []>} : vector<16x256xf32>, vector<256x256xf32>, vector<16x256xf32> -> vector<16x256xf32>
    %28 = arith.addf %26, %27 : vector<16x256xf32>
    %29 = vector.broadcast %20 : vector<1x256xf32> to vector<16x256xf32>
    %30 = arith.addf %28, %29 : vector<16x256xf32>
    %cst_27 = arith.constant 0.000000e+00 : f32
    %31 = vector.broadcast %cst_27 : f32 to vector<16x256xf32>
    %32 = arith.maximumf %30, %31 : vector<16x256xf32>
    %c0_28 = arith.constant 0 : index
    %c0_29 = arith.constant 0 : index
    %33 = vector.load %arg8[%c0_28, %c0_29] : memref<1x128xf32, #tpu.memory_space<vmem>>, vector<1x128xf32>
    %cst_30 = arith.constant dense<0.000000e+00> : vector<16x256xf32>
    %34 = tpu.matmul %1, %32, %cst_30 {dimension_numbers = #tpu.dot_dimension_numbers<[1], [0], [0], [1], [0, 0, 1, 1], [], []>} : vector<16x16xf32>, vector<16x256xf32>, vector<16x256xf32> -> vector<16x256xf32>
    %c0_31 = arith.constant 0 : index
    %c0_32 = arith.constant 0 : index
    %c0_33 = arith.constant 0 : index
    %35 = vector.load %arg7[%c0_31, %c0_32, %c0_33] : memref<2x256x128xf32, #tpu.memory_space<vmem>>, vector<1x256x128xf32>
    %36 = vector.shape_cast %35 : vector<1x256x128xf32> to vector<256x128xf32>
    %c1_34 = arith.constant 1 : index
    %c0_35 = arith.constant 0 : index
    %c0_36 = arith.constant 0 : index
    %37 = vector.load %arg7[%c1_34, %c0_35, %c0_36] : memref<2x256x128xf32, #tpu.memory_space<vmem>>, vector<1x256x128xf32>
    %38 = vector.shape_cast %37 : vector<1x256x128xf32> to vector<256x128xf32>
    %cst_37 = arith.constant dense<0.000000e+00> : vector<16x128xf32>
    %39 = tpu.matmul %32, %36, %cst_37 {dimension_numbers = #tpu.dot_dimension_numbers<[1], [0], [0], [1], [0, 0, 1, 1], [], []>} : vector<16x256xf32>, vector<256x128xf32>, vector<16x128xf32> -> vector<16x128xf32>
    %cst_38 = arith.constant dense<0.000000e+00> : vector<16x128xf32>
    %40 = tpu.matmul %34, %38, %cst_38 {dimension_numbers = #tpu.dot_dimension_numbers<[1], [0], [0], [1], [0, 0, 1, 1], [], []>} : vector<16x256xf32>, vector<256x128xf32>, vector<16x128xf32> -> vector<16x128xf32>
    %41 = arith.addf %39, %40 : vector<16x128xf32>
    %42 = vector.broadcast %33 : vector<1x128xf32> to vector<16x128xf32>
    %43 = arith.addf %41, %42 : vector<16x128xf32>
    %c0_39 = arith.constant 0 : index
    %c0_40 = arith.constant 0 : index
    %c0_41 = arith.constant 0 : index
    %44 = vector.load %arg9[%c0_39, %c0_40, %c0_41] : memref<1x16x128xf32, #tpu.memory_space<vmem>>, vector<1x16x128xf32>
    %45 = vector.shape_cast %44 : vector<1x16x128xf32> to vector<16x128xf32>
    %46 = vector.shape_cast %43 : vector<16x128xf32> to vector<1x16x128xf32>
    tpu.vector_store %arg9[%c0_39, %c0_40, %c0_41], %46 {strides = array<i32>} : memref<1x16x128xf32, #tpu.memory_space<vmem>>, vector<1x16x128xf32>,
    return
  }
  func.func @transform_0(%arg0: i32) -> (i32, i32, i32) {
    %c0_i32 = arith.constant 0 : i32
    %c0_i32_0 = arith.constant 0 : i32
    %c0_i32_1 = arith.constant 0 : i32
    return %arg0, %c0_i32, %c0_i32_0 : i32, i32, i32
  }
  func.func @transform_1(%arg0: i32) -> (i32, i32, i32) {
    %c0_i32 = arith.constant 0 : i32
    %c0_i32_0 = arith.constant 0 : i32
    %c0_i32_1 = arith.constant 0 : i32
    return %arg0, %c0_i32, %c0_i32_0 : i32, i32, i32
  }
  func.func @transform_2(%arg0: i32) -> (i32, i32, i32) {
    %c0_i32 = arith.constant 0 : i32
    %c0_i32_0 = arith.constant 0 : i32
    %c0_i32_1 = arith.constant 0 : i32
    %c0_i32_2 = arith.constant 0 : i32
    return %c0_i32, %c0_i32_0, %c0_i32_1 : i32, i32, i32
  }
  func.func @transform_3(%arg0: i32) -> (i32, i32) {
    %c0_i32 = arith.constant 0 : i32
    %c0_i32_0 = arith.constant 0 : i32
    %c0_i32_1 = arith.constant 0 : i32
    return %c0_i32, %c0_i32_0 : i32, i32
  }
  func.func @transform_4(%arg0: i32) -> (i32, i32, i32) {
    %c0_i32 = arith.constant 0 : i32
    %c0_i32_0 = arith.constant 0 : i32
    %c0_i32_1 = arith.constant 0 : i32
    %c0_i32_2 = arith.constant 0 : i32
    return %c0_i32, %c0_i32_0, %c0_i32_1 : i32, i32, i32
  }
  func.func @transform_5(%arg0: i32) -> (i32, i32, i32) {
    %c0_i32 = arith.constant 0 : i32
    %c0_i32_0 = arith.constant 0 : i32
    %c0_i32_1 = arith.constant 0 : i32
    %c0_i32_2 = arith.constant 0 : i32
    return %c0_i32, %c0_i32_0, %c0_i32_1 : i32, i32, i32
  }
  func.func @transform_6(%arg0: i32) -> (i32, i32, i32) {
    %c0_i32 = arith.constant 0 : i32
    %c0_i32_0 = arith.constant 0 : i32
    %c0_i32_1 = arith.constant 0 : i32
    %c0_i32_2 = arith.constant 0 : i32
    return %c0_i32, %c0_i32_0, %c0_i32_1 : i32, i32, i32
  }
  func.func @transform_7(%arg0: i32) -> (i32, i32) {
    %c0_i32 = arith.constant 0 : i32
    %c0_i32_0 = arith.constant 0 : i32
    %c0_i32_1 = arith.constant 0 : i32
    return %c0_i32, %c0_i32_0 : i32, i32
  }
  func.func @transform_8(%arg0: i32) -> (i32, i32, i32) {
    %c0_i32 = arith.constant 0 : i32
    %c0_i32_0 = arith.constant 0 : i32
    %c0_i32_1 = arith.constant 0 : i32
    return %arg0, %c0_i32, %c0_i32_0 : i32, i32, i32
  }
}

</mosaic_0001>

<bundles_post_ra>
// kernel: tpu_custom_call.1
= control target key start
LH: loop header
LB: loop body
LE: loop exit
PB: predicated region body
PF: predicated region fallthrough
CT: control target
= control target key end

     0   :  { %s2348_s0 = inlined_call_operand.hbm [shape: f32[2,16,16], index: 0, kind: input, shape index: {}]   ;;  %s2349_s1 = inlined_call_operand.hbm [shape: f32[2,16,128], index: 1, kind: input, shape index: {}]   ;;  %s2350_s2 = inlined_call_operand.hbm [shape: f32[2,32,256], index: 2, kind: input, shape index: {}]   ;;  %s2351_s3 = inlined_call_operand.vmem [shape: f32[1,256], index: 3, kind: input, shape index: {}]   ;;  %s2352_s4 = inlined_call_operand.hbm [shape: f32[2,256,256], index: 4, kind: input, shape index: {}]   ;;  %s2353_s5 = inlined_call_operand.vmem [shape: f32[1,1,256], index: 5, kind: input, shape index: {}]   ;;  %s2354_s6 = inlined_call_operand.hbm [shape: f32[2,256,128], index: 6, kind: input, shape index: {}]   ;;  %s2355_s7 = inlined_call_operand.vmem [shape: f32[1,128], index: 7, kind: input, shape index: {}]   ;;  %s2356_s8 = inlined_call_operand.hbm [shape: f32[2,16,128], index: 8, kind: output, shape index: {}]  }
   0x1   :  { %2367 = sst [smem:[#allocation20_spill]] %s2348_s0 }
   0x2   :  { %2368 = sst [smem:[#allocation21_spill]] %s2350_s2 }
   0x3   :  { %2369 = sst [smem:[#allocation22_spill]] %s2352_s4 }
   0x4   :  { %2370 = sst [smem:[#allocation23_spill]] %s2354_s6 }
   0x5   :  { %13 = vsyncpa [#allocation3], 0 }
   0x6   :  { %15 = vsyncpa [#allocation3 + $0x1], 0 }
   0x7   :  { %16 = vsyncpa [#allocation6], 0 }
   0x8   :  { %18 = vsyncpa [#allocation6 + $0x1], 0 }
   0x9   :  { %19 = vsyncpa [#allocation9], 0 }
   0xa   :  { %20 = vsyncpa [#allocation4], 0 }
   0xb   :  { %22 = vsyncpa [#allocation4 + $0x1], 0  ;;  %s2002_s27 = smov 0   ;;  %s2004_s28 = smov 0  }
   0xc   :  { %s2006_s29 = smov 0   ;;  %s2008_s30 = smov 0  }
   0xd LB: > { %2371 = sst [smem:[#allocation17_spill]] %s1938_s29  ;;  %s2023_s9 = sadd.s32 4294967295, %s1942_s30   ;;  %s1942_s30 = sphi %s2008_s30, %s2395_s30   ;;  %s1938_s29 = sphi %s2006_s29, %s2397_s29   ;;  %s1934_s28 = sphi %s2004_s28, %s2399_s28   ;;  %s1930_s27 = sphi %s2002_s27, %s2398_s27  }
   0xe   : > { %s1518_s10 = sadd.s32 4294967294, %s1942_s30   ;;  %p48_p0 = scmp.ne.s32.totalorder %s1934_s28, %s1930_s27 }
   0xf   : > { %p2357_p1 = scmp.eq.s32.totalorder %s2023_s9, 0  ;;  %p230_p3 = scmp.eq.s32.totalorder %s1518_s10, 1 }
  0x10   : > { %p1519_p5 = scmp.ge.s32.totalorder %s1942_s30, 1  ;;  %p237_p7 = scmp.lt.s32.totalorder %s1942_s30, 3 }
  0x11   : > { %p2032_p4 = por %p2357_p1, %p48_p0  ;;  %p2037_p6 = por %p230_p3, %p48_p0 }
  0x12   : > { %p2042_p8 = pnand %p1519_p5, %p237_p7  ;;  %s1944_s14 = smov [#allocation7]  }
  0x13   : > { %s2372_s11 = scalar_select %p2032_p4, 1, 0 }
  0x14   : > { %s2373_s12 = scalar_select %p2037_p6, 1, 0 }
  0x15   : > { %s249_s15 = sshll.u32 %s1944_s14, 4  ;;  %p1661_p9 = pneg %p2042_p8  ;;  %s250_s15 = int_to_ptr.vmem [resolvable:$true] %s249_s15 }
  0x16   : > { %s1945_s17 = smov [#allocation8]   ;;  %s1946_s19 = smov [#allocation10]  }
  0x17   : > { %p2051_p11 = pnand %p1661_p9, %p2357_p1  ;;  %s265_s18 = sshll.u32 %s1945_s17, 4  ;;  %s266_s18 = int_to_ptr.vmem [resolvable:$true] %s265_s18 }
  0x18   : > { %s281_s20 = sshll.u32 %s1946_s19, 4  ;;  %s1743_s21 = scalar_lea.vmem %s250_s15, 2048  ;;  %s282_s20 = int_to_ptr.vmem [resolvable:$true] %s281_s20 }
  0x19   : > { %p1734_p12 = pneg %p2051_p11  ;;  %p1744_p13 = scmp.ne.s32.totalorder %s250_s15, %s1743_s21 }
  0x1a   : > { %p1751_p5 = scmp.lt.s32.totalorder %s250_s15, %s250_s15  ;;  %p1752_p7 = scmp.lt.s32.totalorder %s1743_s21, %s1743_s21 }
  0x1b   : > { %p1746_p0 = pnand %p1744_p13, %p1734_p12 }
  0x1c   : > { %p1753_p9 = por %p1752_p7, %p1751_p5 }
  0x1d   : > { %p1747_p3 = pneg %p1746_p0 }
  0x1f   : > { %p1754_p10 = pnand %p1753_p9, %p1747_p3 }
  0x21   : > { %1757 = shalt.err (!%p1754_p10)
}
  0x22   : > { %s1947_s22 = smov 256   ;;  %s1948_s23 = smov 16  }
  0x23   : > { %s2376_s2 = sld [smem:[#allocation21_spill]]  ;;  %s1769_s26 = scalar_lea.vmem %s266_s18, 16384 }
  0x24   : > { %p1770_p1 = scmp.ne.s32.totalorder %s266_s18, %s1769_s26  ;;  %p1777_p2 = scmp.lt.s32.totalorder %s266_s18, %s266_s18 }
  0x25   : > { %p1778_p6 = scmp.lt.s32.totalorder %s1769_s26, %s1769_s26 }
  0x26   : > { %p1772_p13 = pnand %p1770_p1, %p1734_p12 }
  0x27   : > { %p1779_p5 = por %p1778_p6, %p1777_p2 }
  0x28   : > { %p1773_p0 = pneg %p1772_p13 }
  0x29   : > { %1664 = dma.hbm_to_vmem [thread:$0]  (!%p2051_p11), %s2376_s2, 2048, %s250_s15, [#allocation6], %s1947_s22, %s1947_s22, %s1948_s23  }
  0x2a   : > { %p1780_p3 = pnand %p1779_p5, %p1773_p0 }
  0x2c   : > { %1783 = shalt.err (!%p1780_p3)
}
  0x2d   : > { %s2377_s4 = sld [smem:[#allocation22_spill]]  ;;  %s1795_s15 = scalar_lea.vmem %s282_s20, 8192 }
  0x2e   : > { %p1796_p10 = scmp.ne.s32.totalorder %s282_s20, %s1795_s15  ;;  %p1803_p9 = scmp.lt.s32.totalorder %s282_s20, %s282_s20 }
  0x2f   : > { %p1804_p13 = scmp.lt.s32.totalorder %s1795_s15, %s1795_s15 }
  0x30   : > { %p1798_p7 = pnand %p1796_p10, %p1734_p12 }
  0x31   : > { %p1805_p4 = por %p1804_p13, %p1803_p9 }
  0x32   : > { %p1799_p1 = pneg %p1798_p7 }
  0x33   : > { %1667 = dma.hbm_to_vmem [thread:$0]  (!%p2051_p11), %s2377_s4, 16384, %s266_s18, [#allocation9], %s1947_s22, %s1947_s22, %s1948_s23  }
  0x34   : > { %p1806_p2 = pnand %p1805_p4, %p1799_p1 }
  0x36   : > { %1809 = shalt.err (!%p1806_p2)
}
  0x37   : > { %s2359_s17 = smov 128   ;;  %s2361_s18 = smov 8  }
  0x38   : > { %s2378_s6 = sld [smem:[#allocation23_spill]]  ;;  %s2085_s22 = sadd.s32 1, %s1942_s30  }
  0x39   : > { %2379 = sst [smem:[#allocation18_spill]] %s2085_s22  ;;  %s32_s23 = ssub.s32 %s1942_s30, %s2085_s22 }
  0x3a   : > { %s35_s24 = sadd.s32 1, %s1938_s29  ;;  %p33_p4 = scmp.eq.s32.totalorder %s32_s23, 0 }
  0x3b   : > { %p42_p6 = scmp.ne.s32.totalorder %s1938_s29, %s1934_s28  ;;  %p43_p12 = scmp.eq.s32.totalorder %s1942_s30, 0 }
  0x3c   : > { %p1685_p0 = scmp.lt.s32.totalorder %s1942_s30, 2  ;;  %p2381_p3 = scmp.eq.s32.totalorder %s2023_s9, 1 }
  0x3d   : > { %s2095_s25 = scalar_select %p33_p4, %s1938_s29, %s35_s24  }
  0x3e   : > { %1670 = dma.hbm_to_vmem [thread:$0]  (!%p2051_p11), %s2378_s6, 8192, %s282_s20, [#allocation9], %s2359_s17, %s2359_s17, %s2361_s18  }
  0x3f   : > { %2380 = sst [smem:[#allocation19_spill]] %s2095_s25  ;;  %p44_p5 = por %p43_p12, %p42_p6 }
  0x40   : > { %p2099_p10 = por %p2381_p3, %p42_p6  ;;  %s298_s26 = sand.u32 1, %s1938_s29  }
  0x41   : > { %s1553_s10 = sshll.u32 %s1942_s30, 8  ;;  %s2105_s20 = sshll.u32 %s298_s26, 4 }
  0x42   : > { %s2382_s16 = scalar_select %p2099_p10, 1, 0 }
  0x43   : > { %s2383_s0 = sld [smem:[#allocation20_spill]]  ;;  %s302_s21 = scalar_lea.vmem [#allocation2], %s2105_s20 }
  0x44   : > { %s309_s23 = sshll.u32 %s302_s21, 4  ;;  %p2113_p11 = pnand %p1685_p0, %p44_p5  ;;  %s2117_s23 = int_to_ptr.vmem [resolvable:$true] %s309_s23 }
  0x45   : > { %s2122_s14 = scalar_lea.hbm %s2349_s1, %s1553_s10  ;;  %s2124_s15 = scalar_lea.sflag [#allocation3], %s298_s26 }
  0x46   : > { %p1812_p1 = pneg %p2113_p11 }
  0x49   : > { %s2110_s19 = scalar_lea.hbm %s2383_s0, %s1553_s10  ;;  %s1815_s6 = scalar_lea.hbm %s2383_s0, 512 }
  0x4a   : > { %s1810_s2 = scalar_lea.hbm %s2110_s19, 256  ;;  %p1816_p2 = scmp.lt.s32.totalorder %s2110_s19, %s2383_s0 }
  0x4b   : > { %p1811_p7 = scmp.ne.s32.totalorder %s2110_s19, %s1810_s2  ;;  %p1817_p4 = scmp.lt.s32.totalorder %s1815_s6, %s1810_s2 }
  0x4d   : > { %p1813_p9 = pnand %p1812_p1, %p1811_p7  ;;  %p1818_p6 = por %p1817_p4, %p1816_p2 }
  0x4f   : > { %p1814_p13 = pneg %p1813_p9 }
  0x51   : > { %p1819_p12 = pnand %p1818_p6, %p1814_p13 }
  0x53   : > { %1822 = shalt.err (!%p1819_p12)
}
  0x54   : > { %s1823_s17 = scalar_lea.vmem %s2117_s23, 256  ;;  %s1951_s4 = smov [#allocation2]  }
  0x55   : > { %p1824_p0 = scmp.ne.s32.totalorder %s2117_s23, %s1823_s17  ;;  %s1828_s18 = sshll.u32 %s1951_s4, 4  ;;  %s1829_s18 = int_to_ptr.vmem [resolvable:$false] %s1828_s18 }
  0x56   : > { %s1830_s26 = scalar_lea.vmem %s1829_s18, 512  ;;  %p1831_p7 = scmp.lt.s32.totalorder %s2117_s23, %s1829_s18 }
  0x57   : > { %p1826_p5 = pnand %p1824_p0, %p1812_p1  ;;  %p1832_p9 = scmp.lt.s32.totalorder %s1830_s26, %s1823_s17 }
  0x59   : > { %p1827_p3 = pneg %p1826_p5  ;;  %p1833_p10 = por %p1832_p9, %p1831_p7 }
  0x5b   : > { %p1834_p2 = pnand %p1833_p10, %p1827_p3 }
  0x5d   : > { %1837 = shalt.err (!%p1834_p2)
}
  0x5e   : > { %s2385_s2 = smov 8   ;;  %s2386_s6 = smov 128  }
  0x5f   : > { %1674 = dma.hbm_to_vmem [thread:$0]  (!%p2113_p11), %s2110_s19, 256, %s2117_s23, %s2124_s15, %s2386_s6, %s2386_s6, %s2385_s2  }
  0x60   : > { %s323_s29 = scalar_lea.vmem [#allocation5], %s2105_s20  ;;  %s319_s10 = sand.u32 1, %s1942_s30  }
  0x61   : > { %s330_s25 = sshll.u32 %s323_s29, 4  ;;  %s320_s21 = scalar_lea.sflag [#allocation6], %s319_s10  ;;  %s2156_s25 = int_to_ptr.vmem [resolvable:$true] %s330_s25 }
  0x62   : > { %s1838_s17 = scalar_lea.hbm %s2122_s14, 256  ;;  %s1843_s26 = scalar_lea.hbm %s2349_s1, 512 }
  0x63   : > { %p1839_p10 = scmp.ne.s32.totalorder %s2122_s14, %s1838_s17  ;;  %p1844_p6 = scmp.lt.s32.totalorder %s2122_s14, %s2349_s1 }
  0x64   : > { %p1845_p12 = scmp.lt.s32.totalorder %s1843_s26, %s1838_s17 }
  0x65   : > { %p1841_p13 = pnand %p1839_p10, %p1812_p1 }
  0x66   : > { %p1846_p0 = por %p1845_p12, %p1844_p6 }
  0x67   : > { %p1842_p4 = pneg %p1841_p13 }
  0x69   : > { %p1847_p5 = pnand %p1846_p0, %p1842_p4 }
  0x6b   : > { %1850 = shalt.err (!%p1847_p5)
}
  0x6c   : > { %s1851_s20 = scalar_lea.vmem %s2156_s25, 256  ;;  %s1952_s19 = smov [#allocation5]  }
  0x6d   : > { %p1852_p3 = scmp.ne.s32.totalorder %s2156_s25, %s1851_s20  ;;  %s1856_s23 = sshll.u32 %s1952_s19, 4  ;;  %s1857_s23 = int_to_ptr.vmem [resolvable:$false] %s1856_s23 }
  0x6e   : > { %s1858_s15 = scalar_lea.vmem %s1857_s23, 512  ;;  %p1859_p2 = scmp.lt.s32.totalorder %s2156_s25, %s1857_s23 }
  0x6f   : > { %p1854_p7 = pnand %p1852_p3, %p1812_p1  ;;  %p1860_p10 = scmp.lt.s32.totalorder %s1858_s15, %s1851_s20 }
  0x71   : > { %p1855_p9 = pneg %p1854_p7  ;;  %p1861_p13 = por %p1860_p10, %p1859_p2 }
  0x73   : > { %p1862_p6 = pnand %p1861_p13, %p1855_p9 }
  0x75   : > { %1865 = shalt.err (!%p1862_p6)
}
  0x76   : > { %1677 = dma.hbm_to_vmem [thread:$0]  (!%p2113_p11), %s2122_s14, 256, %s2156_s25, %s320_s21, %s2386_s6, %s2386_s6, %s2385_s2  }
  0x77   : > { %342 = sbr.rel (%p2042_p8) target bundleno = 1363 (0x553), region = 52  ;;  %s2186_s0 = sand.u32 (!%p2042_p8), 1, %s1934_s28  }
  0x78   : > { %s2189_s22 = sshll.u32 (!%p2042_p8), %s2186_s0, 4  ;;  %s345_s29 = scalar_lea.sflag (!%p2042_p8), [#allocation3], %s2186_s0 }
  0x79   : > { %s348_s24 = scalar_lea.vmem (!%p2042_p8), [#allocation2], %s2189_s22  ;;  %p2387_p1 = scmp.ne.s32.totalorder (!%p2042_p8), %s2372_s11, 0 }
  0x7c   : > { %1909 = dma.done.wait (%p2387_p1), %s345_s29, 256  }
  0x7d   : > { %1911 = vsyncadd (%p2387_p1), %s345_s29, 4294967040  ;;  %s353_s13 = sand.u32 1, %s2023_s9   ;;  %s357_s2 = scalar_lea.vmem [#allocation5], %s2189_s22 }
  0x7e   : > { %s354_s14 = scalar_lea.sflag [#allocation6], %s353_s13 }
  0x7f   : > { %1913 = dma.done.wait (%p2387_p1), %s354_s14, 256  }
  0x80   : > { %1915 = vsyncadd (%p2387_p1), %s354_s14, 4294967040  ;;  %p2388_p8 = scmp.eq.s32.totalorder %s2023_s9, 0 }
  0x82   : > { %1917 = dma.done.wait (%p2388_p8), [#allocation6], 2048   ;;  %p2389_p11 = pmov %p2388_p8 }
  0x83   : > { %p2390_p4 = pmov %p2388_p8 }
  0x84   : > { %1919 = vsyncadd (%p2389_p11), [#allocation6], 4294965248 }
  0x85   : > { %1921 = dma.done.wait (%p2390_p4), [#allocation9], 24576   ;;  %p2391_p12 = pmov %p2390_p4 }
  0x86   : > { %vm412_vm0 = vcmask 130048   ;;  %v410_v0 = vld [vmem:[%s357_s2 + $0x8] sm:$0xff]  ;;  %v409_v1 = vld [vmem:[%s357_s2] sm:$0xff]  ;;  %vm511_vm1 = vcmask 261120   ;;  %v1953_v19 = vmov 0.0   ;;  %v679_v63 = vlaneseq  ;;  %s406_s4 = scalar_lea.vmem [#allocation11], %s2189_s22 }
  0x87   : > { %1923 = vsyncadd (%p2391_p12), [#allocation9], 4294942720  ;;  %v2211_v2 = vld [vmem:[%s348_s24] sm:$0xff]  ;;  %1636 = vmatprep.subr.mxu0 %v410_v0  ;;  %v2215_v3 = vld [vmem:[%s348_s24 + $0x8] sm:$0xff]  ;;  %582 = vmatprep.mubr.f32.mxu1 %v1953_v19  ;;  %s1394_s18 = sshll.u32 %s406_s4, 4  ;;  %s1555_s26 = sshll.u32 %s2023_s9, 8  ;;  %s2300_s18 = int_to_ptr.vmem [resolvable:$true] %s1394_s18 }
  0x88   : > { %1640 = vmatprep.mubr.msk.f32.mxu0 %vm412_vm0, %v2211_v2  ;;  %1637 = vmatpush3.msra.mxu0 %v410_v0  ;;  %v501_v4 = vld [vmem:[#allocation7 + $0x38] sm:$0xff]  ;;  %v509_v6 = vld [vmem:[#allocation7 + $0x70] sm:$0xff]  ;;  %v508_v8 = vld [vmem:[#allocation7 + $0x68] sm:$0xff]  ;;  %s2305_s23 = scalar_lea.hbm %s2356_s8, %s1555_s26  ;;  %s1381_s15 = scalar_lea.sflag [#allocation4], %s2186_s0 }
  0x89   : > { %v510_v5 = vld [vmem:[#allocation7 + $0x78] sm:$0xff]  ;;  %1638 = vmatprep.subr.mxu0 %v409_v1  ;;  %v500_v7 = vld [vmem:[#allocation7 + $0x30] sm:$0xff]  ;;  %v499_v9 = vld [vmem:[#allocation7 + $0x28] sm:$0xff]  ;;  %s1866_s22 = scalar_lea.vmem %s2300_s18, 256  ;;  %p2392_p5 = scmp.ne.s32.totalorder %s2382_s16, 0 }
  0x8a   : > { %542 = vmatprep.subr.mxu1 %v510_v5  ;;  %1639 = vmatpush3.msra.mxu0 %v409_v1  ;;  %v507_v10 = vld [vmem:[#allocation7 + $0x60] sm:$0xff]  ;;  %v506_v12 = vld [vmem:[#allocation7 + $0x58] sm:$0xff]  ;;  %v496_v14 = vld [vmem:[#allocation7 + $0x10] sm:$0xff]  ;;  %p1867_p0 = scmp.ne.s32.totalorder %s2300_s18, %s1866_s22  ;;  %s1954_s9 = smov [#allocation11]  }
  0x8b   : > { %543 = vmatpush1.msra.mxu1 %v509_v6  ;;  %1641 = vmatmul.mubr.msk.f32.vlgmr.msra.gmra.mxu0 %vm412_vm0, %v2215_v3  ;;  %v498_v11 = vld [vmem:[#allocation7 + $0x20] sm:$0xff]  ;;  %v497_v13 = vld [vmem:[#allocation7 + $0x18] sm:$0xff]  ;;  %v495_v15 = vld [vmem:[#allocation7 + $0x8] sm:$0xff]  ;;  %v2224_v6 = vshrl.u32 %v679_v63, 7  ;;  %s1870_s29 = sshll.u32 %s1954_s9, 4  ;;  %s1871_s29 = int_to_ptr.vmem [resolvable:$false] %s1870_s29 }
  0x8c   : > { %625 = vmatprep.subr.mxu0 %v501_v4  ;;  %544 = vmatprep.subr.mxu1 %v508_v8  ;;  %v505_v16 = vld [vmem:[#allocation7 + $0x50] sm:$0xff]  ;;  %v494_v17 = vld [vmem:[#allocation7] sm:$0xff]  ;;  %v504_v18 = vld [vmem:[#allocation7 + $0x48] sm:$0xff]  ;;  %p1868_p3 = pnand %p1867_p0, %p2392_p5  ;;  %s1872_s24 = scalar_lea.vmem %s1871_s29, 512 }
  0x8d   : > { %626 = vmatpush1.msra.mxu0 %v500_v7  ;;  %545 = vmatpush1.msra.mxu1 %v507_v10  ;;  %v503_v20 = vld [vmem:[#allocation7 + $0x40] sm:$0xff]  ;;  %v871_v23 = vld [vmem:[#allocation8 + $0x2f8] sm:$0xff]  ;;  %v870_v24 = vld [vmem:[#allocation8 + $0x2f0] sm:$0xff]  ;;  %p1873_p9 = scmp.lt.s32.totalorder %s2300_s18, %s1871_s29  ;;  %p1874_p2 = scmp.lt.s32.totalorder %s1872_s24, %s1866_s22 }
  0x8e   : > { %627 = vmatprep.subr.mxu0 %v499_v9  ;;  %546 = vmatprep.subr.mxu1 %v506_v12  ;;  %v869_v25 = vld [vmem:[#allocation8 + $0x2e8] sm:$0xff]  ;;  %v868_v26 = vld [vmem:[#allocation8 + $0x2e0] sm:$0xff]  ;;  %v867_v27 = vld [vmem:[#allocation8 + $0x2d8] sm:$0xff]  ;;  %v685_v12 = vsub.s32 1, %v2224_v6  ;;  %p1869_p7 = pneg %p1868_p3 }
  0x8f   : > { %628 = vmatpush1.msra.mxu0 %v498_v11  ;;  %547 = vmatpush1.msra.mxu1 %v505_v16  ;;  %v866_v28 = vld [vmem:[#allocation8 + $0x2d0] sm:$0xff]  ;;  %v865_v29 = vld [vmem:[#allocation8 + $0x2c8] sm:$0xff]  ;;  %v864_v30 = vld [vmem:[#allocation8 + $0x2c0] sm:$0xff]  ;;  %p1875_p10 = por %p1874_p2, %p1873_p9 }
  0x90   : > { %629 = vmatprep.subr.mxu0 %v497_v13  ;;  %665 = vmatprep.mubr.f32.mxu0 %v1953_v19  ;;  %v863_v31 = vld [vmem:[#allocation8 + $0x2b8] sm:$0xff]  ;;  %v862_v32 = vld [vmem:[#allocation8 + $0x2b0] sm:$0xff]  ;;  %v861_v33 = vld [vmem:[#allocation8 + $0x2a8] sm:$0xff] }
  0x91   : > { %630 = vmatpush1.msra.mxu0 %v496_v14  ;;  %548 = vmatprep.subr.mxu1 %v504_v18  ;;  %v860_v34 = vld [vmem:[#allocation8 + $0x2a0] sm:$0xff]  ;;  %v859_v35 = vld [vmem:[#allocation8 + $0x298] sm:$0xff]  ;;  %v858_v36 = vld [vmem:[#allocation8 + $0x290] sm:$0xff]  ;;  %v681_v14 = vsub.s32 0, %v2224_v6  ;;  %p1876_p13 = pnand %p1875_p10, %p1869_p7 }
  0x92   : > { %631 = vmatprep.subr.mxu0 %v495_v15  ;;  %549 = vmatpush1.msra.mxu1 %v503_v20  ;;  %v857_v37 = vld [vmem:[#allocation8 + $0x288] sm:$0xff]  ;;  %v856_v38 = vld [vmem:[#allocation8 + $0x280] sm:$0xff]  ;;  %v855_v39 = vld [vmem:[#allocation8 + $0x278] sm:$0xff] }
  0x93   : > { %632 = vmatpush1.msra.mxu0 %v494_v17  ;;  %v854_v40 = vld [vmem:[#allocation8 + $0x270] sm:$0xff]  ;;  %v853_v41 = vld [vmem:[#allocation8 + $0x268] sm:$0xff]  ;;  %v852_v42 = vld [vmem:[#allocation8 + $0x260] sm:$0xff] }
  0x94   : > { %1541 = vmatmul.mubr.msk.f32.vlgmr.msra.gmra.mxu0 %vm511_vm1, %v409_v1  ;;  %904 = vmatprep.subr.mxu0 %v871_v23  ;;  %v851_v43 = vld [vmem:[#allocation8 + $0x258] sm:$0xff]  ;;  %v850_v44 = vld [vmem:[#allocation8 + $0x250] sm:$0xff]  ;;  %v849_v45 = vld [vmem:[#allocation8 + $0x248] sm:$0xff] }
  0x95   : > { %671 = vmatprep.mubr.f32.mxu0 %v1953_v19  ;;  %905 = vmatpush1.msra.mxu0 %v870_v24  ;;  %v848_v46 = vld [vmem:[#allocation8 + $0x240] sm:$0xff]  ;;  %v847_v47 = vld [vmem:[#allocation8 + $0x238] sm:$0xff]  ;;  %v846_v48 = vld [vmem:[#allocation8 + $0x230] sm:$0xff] }
  0x96   : > { %906 = vmatprep.subr.mxu0 %v869_v25  ;;  %v845_v49 = vld [vmem:[#allocation8 + $0x228] sm:$0xff]  ;;  %v844_v50 = vld [vmem:[#allocation8 + $0x220] sm:$0xff]  ;;  %v843_v51 = vld [vmem:[#allocation8 + $0x218] sm:$0xff] }
  0x97   : > { %907 = vmatpush1.msra.mxu0 %v868_v26  ;;  %v842_v52 = vld [vmem:[#allocation8 + $0x210] sm:$0xff]  ;;  %v841_v53 = vld [vmem:[#allocation8 + $0x208] sm:$0xff]  ;;  %v840_v54 = vld [vmem:[#allocation8 + $0x200] sm:$0xff] }
  0x98   : > { %1542 = vmatmul.mubr.msk.f32.gmra.mxu0 %vm511_vm1, %v410_v0  ;;  %908 = vmatprep.subr.mxu0 %v867_v27  ;;  %v903_v55 = vld [vmem:[#allocation8 + $0x3f8] sm:$0xff]  ;;  %v902_v56 = vld [vmem:[#allocation8 + $0x3f0] sm:$0xff]  ;;  %v901_v57 = vld [vmem:[#allocation8 + $0x3e8] sm:$0xff] }
  0x99   : > { %909 = vmatpush1.msra.mxu0 %v866_v28  ;;  %v900_v58 = vld [vmem:[#allocation8 + $0x3e0] sm:$0xff]  ;;  %v899_v59 = vld [vmem:[#allocation8 + $0x3d8] sm:$0xff]  ;;  %v898_v60 = vld [vmem:[#allocation8 + $0x3d0] sm:$0xff] }
  0x9a   : > { %910 = vmatprep.subr.mxu0 %v865_v29  ;;  %v897_v61 = vld [vmem:[#allocation8 + $0x3c8] sm:$0xff]  ;;  %v896_v0 = vld [vmem:[#allocation8 + $0x3c0] sm:$0xff]  ;;  %v895_v1 = vld [vmem:[#allocation8 + $0x3b8] sm:$0xff] }
  0x9b   : > { %911 = vmatpush1.msra.mxu0 %v864_v30  ;;  %v894_v4 = vld [vmem:[#allocation8 + $0x3b0] sm:$0xff]  ;;  %v893_v5 = vld [vmem:[#allocation8 + $0x3a8] sm:$0xff]  ;;  %v892_v8 = vld [vmem:[#allocation8 + $0x3a0] sm:$0xff] }
  0x9c   : > { %912 = vmatprep.subr.mxu0 %v863_v31  ;;  %v891_v9 = vld [vmem:[#allocation8 + $0x398] sm:$0xff]  ;;  %v890_v11 = vld [vmem:[#allocation8 + $0x390] sm:$0xff]  ;;  %v889_v13 = vld [vmem:[#allocation8 + $0x388] sm:$0xff] }
  0x9d   : > { %913 = vmatpush1.msra.mxu0 %v862_v32  ;;  %v888_v17 = vld [vmem:[#allocation8 + $0x380] sm:$0xff]  ;;  %v887_v20 = vld [vmem:[#allocation8 + $0x378] sm:$0xff]  ;;  %v885_v26 = vld [vmem:[#allocation8 + $0x368] sm:$0xff] }
  0x9e   : > { %914 = vmatprep.subr.mxu0 %v861_v33  ;;  %v411_v18 = vld [vmem:[%s2351_s3] sm:$0x3]  ;;  %v883_v33 = vld [vmem:[#allocation8 + $0x358] sm:$0xff]  ;;  %v792_v63 = vld [vmem:[#allocation8 + $0x88] sm:$0xff] }
  0x9f   : > { %915 = vmatpush1.msra.mxu0 %v860_v34  ;;  %v686_v24 = vrot.slane %v411_v18, %v685_v12  ;;  %v682_v28 = vrot.slane %v411_v18, %v681_v14  ;;  %v884_v31 = vld [vmem:[#allocation8 + $0x360] sm:$0xff]  ;;  %v778_v18 = vld [vmem:[#allocation8 + $0x18] sm:$0xff] }
  0xa0   : > { %916 = vmatprep.subr.mxu0 %v859_v35  ;;  %v882_v35 = vld [vmem:[#allocation8 + $0x350] sm:$0xff] }
  0xa1   : > { %917 = vmatpush1.msra.mxu0 %v858_v36 }
  0xa2   : > { %918 = vmatprep.subr.mxu0 %v857_v37 }
  0xa3   : > { %919 = vmatpush1.msra.mxu0 %v856_v38  ;;  %v881_v38 = vld [vmem:[#allocation8 + $0x348] sm:$0xff] }
  0xa4   : > { %920 = vmatprep.subr.mxu0 %v855_v39 }
  0xa5   : > { %921 = vmatpush1.msra.mxu0 %v854_v40  ;;  %v880_v40 = vld [vmem:[#allocation8 + $0x340] sm:$0xff] }
  0xa6   : > { %922 = vmatprep.subr.mxu0 %v853_v41 }
  0xa7   : > { %923 = vmatpush1.msra.mxu0 %v852_v42  ;;  %v879_v42 = vld [vmem:[#allocation8 + $0x338] sm:$0xff] }
  0xa8   : > { %924 = vmatprep.subr.mxu0 %v851_v43 }
  0xa9   : > { %925 = vmatpush1.msra.mxu0 %v850_v44  ;;  %v878_v44 = vld [vmem:[#allocation8 + $0x330] sm:$0xff] }
  0xaa   : > { %926 = vmatprep.subr.mxu0 %v849_v45 }
  0xab   : > { %927 = vmatpush1.msra.mxu0 %v848_v46  ;;  %v877_v46 = vld [vmem:[#allocation8 + $0x328] sm:$0xff] }
  0xac   : > { %928 = vmatprep.subr.mxu0 %v847_v47 }
  0xad   : > { %929 = vmatpush1.msra.mxu0 %v846_v48  ;;  %v806_v48 = vld [vmem:[#allocation8 + $0xf8] sm:$0xff] }
  0xae   : > { %930 = vmatprep.subr.mxu0 %v845_v49  ;;  %v805_v49 = vld [vmem:[#allocation8 + $0xf0] sm:$0xff] }
  0xaf   : > { %931 = vmatpush1.msra.mxu0 %v844_v50  ;;  %v804_v50 = vld [vmem:[#allocation8 + $0xe8] sm:$0xff] }
  0xb0   : > { %932 = vmatprep.subr.mxu0 %v843_v51  ;;  %v876_v51 = vld [vmem:[#allocation8 + $0x320] sm:$0xff] }
  0xb1   : > { %933 = vmatpush1.msra.mxu0 %v842_v52  ;;  %v803_v52 = vld [vmem:[#allocation8 + $0xe0] sm:$0xff] }
  0xb2   : > { %934 = vmatprep.subr.mxu0 %v841_v53  ;;  %v802_v53 = vld [vmem:[#allocation8 + $0xd8] sm:$0xff] }
  0xb3   : > { %935 = vmatpush1.msra.mxu0 %v840_v54  ;;  %v801_v54 = vld [vmem:[#allocation8 + $0xd0] sm:$0xff] }
  0xb4   : > { %936 = vmatprep.subr.mxu0 %v903_v55  ;;  %v800_v55 = vld [vmem:[#allocation8 + $0xc8] sm:$0xff] }
  0xb5   : > { %937 = vmatpush2.msra.mxu0 %v902_v56  ;;  %v799_v56 = vld [vmem:[#allocation8 + $0xc0] sm:$0xff] }
  0xb6   : > { %938 = vmatprep.subr.mxu0 %v901_v57  ;;  %v798_v57 = vld [vmem:[#allocation8 + $0xb8] sm:$0xff] }
  0xb7   : > { %939 = vmatpush2.msra.mxu0 %v900_v58  ;;  %v797_v58 = vld [vmem:[#allocation8 + $0xb0] sm:$0xff] }
  0xb8   : > { %940 = vmatprep.subr.mxu0 %v899_v59  ;;  %v796_v59 = vld [vmem:[#allocation8 + $0xa8] sm:$0xff] }
  0xb9   : > { %941 = vmatpush2.msra.mxu0 %v898_v60  ;;  %v795_v60 = vld [vmem:[#allocation8 + $0xa0] sm:$0xff] }
  0xba   : > { %942 = vmatprep.subr.mxu0 %v897_v61  ;;  %v794_v61 = vld [vmem:[#allocation8 + $0x98] sm:$0xff] }
  0xbb   : > { %943 = vmatpush2.msra.mxu0 %v896_v0  ;;  %v791_v0 = vld [vmem:[#allocation8 + $0x80] sm:$0xff] }
  0xbc   : > { %944 = vmatprep.subr.mxu0 %v895_v1  ;;  %v790_v1 = vld [vmem:[#allocation8 + $0x78] sm:$0xff] }
  0xbd   : > { %945 = vmatpush2.msra.mxu0 %v894_v4  ;;  %v789_v4 = vld [vmem:[#allocation8 + $0x70] sm:$0xff] }
  0xbe   : > { %946 = vmatprep.subr.mxu0 %v893_v5  ;;  %v788_v5 = vld [vmem:[#allocation8 + $0x68] sm:$0xff] }
  0xbf   : > { %947 = vmatpush2.msra.mxu0 %v892_v8  ;;  %v786_v8 = vld [vmem:[#allocation8 + $0x58] sm:$0xff] }
  0xc0   : > { %948 = vmatprep.subr.mxu0 %v891_v9  ;;  %v785_v9 = vld [vmem:[#allocation8 + $0x50] sm:$0xff] }
  0xc1   : > { %949 = vmatpush2.msra.mxu0 %v890_v11  ;;  %v783_v11 = vld [vmem:[#allocation8 + $0x40] sm:$0xff] }
  0xc2   : > { %950 = vmatprep.subr.mxu0 %v889_v13  ;;  %v782_v13 = vld [vmem:[#allocation8 + $0x38] sm:$0xff] }
  0xc3   : > { %951 = vmatpush2.msra.mxu0 %v888_v17  ;;  %v779_v17 = vld [vmem:[#allocation8 + $0x20] sm:$0xff] }
  0xc4   : > { %952 = vmatprep.subr.mxu0 %v887_v20  ;;  %v777_v20 = vld [vmem:[#allocation8 + $0x10] sm:$0xff] }
 0x14b   : > { %v1642_v21 = vpop.f32.mrf.mxu0 }
 0x14d   : > { %v485_v22 = vpop.f32.mrf.mxu0 }
 0x14e   : > { %1539 = vmatmul.mubr.msk.f32.vlgmr.msra.gmra.mxu1 %vm511_vm1, %v485_v22  ;;  %v886_v22 = vld [vmem:[#allocation8 + $0x370] sm:$0xff] }
 0x14f   : > { %588 = vmatprep.mubr.f32.mxu1 %v1953_v19  ;;  %953 = vmatpush2.msra.mxu0 %v886_v22  ;;  %v775_v22 = vld [vmem:[#allocation8] sm:$0xff] }
 0x150   : > { %954 = vmatprep.subr.mxu0 %v885_v26  ;;  %v835_v26 = vld [vmem:[#allocation8 + $0x1e0] sm:$0xff] }
 0x151   : > { %955 = vmatpush2.msra.mxu0 %v884_v31  ;;  %v830_v31 = vld [vmem:[#allocation8 + $0x1b8] sm:$0xff] }
 0x152   : > { %1540 = vmatmul.mubr.msk.f32.gmra.mxu1 %vm511_vm1, %v1642_v21  ;;  %956 = vmatprep.subr.mxu0 %v883_v33  ;;  %v828_v33 = vld [vmem:[#allocation8 + $0x1a8] sm:$0xff] }
 0x153   : > { %762 = vmatprep.mubr.f32.mxu1 %v1953_v19  ;;  %957 = vmatpush2.msra.mxu0 %v882_v35  ;;  %v827_v35 = vld [vmem:[#allocation8 + $0x1a0] sm:$0xff] }
 0x154   : > { %v667_v62 = vpop.f32.mrf.mxu0  ;;  %958 = vmatprep.subr.mxu0 %v881_v38  ;;  %v825_v38 = vld [vmem:[#allocation8 + $0x190] sm:$0xff] }
 0x155   : > { %959 = vmatpush2.msra.mxu0 %v880_v40  ;;  %v824_v40 = vld [vmem:[#allocation8 + $0x188] sm:$0xff] }
 0x156   : > { %v669_v7 = vpop.f32.mrf.mxu0  ;;  %960 = vmatprep.subr.mxu0 %v879_v42  ;;  %v823_v42 = vld [vmem:[#allocation8 + $0x180] sm:$0xff] }
 0x157   : > { %961 = vmatpush2.msra.mxu0 %v878_v44  ;;  %v822_v44 = vld [vmem:[#allocation8 + $0x178] sm:$0xff] }
 0x158   : > { %v673_v16 = vpop.f32.mrf.mxu0  ;;  %962 = vmatprep.subr.mxu0 %v877_v46  ;;  %v820_v46 = vld [vmem:[#allocation8 + $0x168] sm:$0xff] }
 0x159   : > { %963 = vmatpush2.msra.mxu0 %v876_v51  ;;  %v816_v51 = vld [vmem:[#allocation8 + $0x148] sm:$0xff] }
 0x15a   : > { %v675_v29 = vpop.f32.mrf.mxu0 }
 0x20e   : > { %v584_v10 = vpop.f32.mrf.mxu1 }
 0x20f   : > { %v668_v27 = vadd.f32 %v667_v62, %v584_v10  ;;  %v793_v62 = vld [vmem:[#allocation8 + $0x90] sm:$0xff]  ;;  %v784_v10 = vld [vmem:[#allocation8 + $0x48] sm:$0xff] }
 0x210   : > { %v586_v15 = vpop.f32.mrf.mxu1 }
 0x211   : > { %v670_v23 = vadd.f32 %v669_v7, %v586_v15  ;;  %v2239_v39 = vadd.f32 %v682_v28, %v668_v27  ;;  %v787_v7 = vld [vmem:[#allocation8 + $0x60] sm:$0xff]  ;;  %v781_v15 = vld [vmem:[#allocation8 + $0x30] sm:$0xff]  ;;  %v834_v27 = vld [vmem:[#allocation8 + $0x1d8] sm:$0xff] }
 0x212   : > { %v590_v21 = vpop.f32.mrf.mxu1 }
 0x213   : > { %v674_v25 = vadd.f32 %v673_v16, %v590_v21  ;;  %v690_v36 = vadd.f32 %v686_v24, %v670_v23  ;;  %v693_v47 = vmax.f32 %v2239_v39, 0.0  ;;  %v780_v16 = vld [vmem:[#allocation8 + $0x28] sm:$0xff]  ;;  %v838_v23 = vld [vmem:[#allocation8 + $0x1f8] sm:$0xff] }
 0x214   : > { %v592_v30 = vpop.f32.mrf.mxu1  ;;  %v776_v21 = vld [vmem:[#allocation8 + $0x8] sm:$0xff] }
 0x215   : > { %v676_v32 = vadd.f32 %v675_v29, %v592_v30  ;;  %v2235_v34 = vadd.f32 %v682_v28, %v674_v25  ;;  %v694_v45 = vmax.f32 %v690_v36, 0.0  ;;  %v836_v25 = vld [vmem:[#allocation8 + $0x1e8] sm:$0xff]  ;;  %v833_v28 = vld [vmem:[#allocation8 + $0x1d0] sm:$0xff]  ;;  %v831_v30 = vld [vmem:[#allocation8 + $0x1c0] sm:$0xff] }
 0x216   : > { %v832_v29 = vld [vmem:[#allocation8 + $0x1c8] sm:$0xff]  ;;  %v826_v36 = vld [vmem:[#allocation8 + $0x198] sm:$0xff] }
 0x217   : > { %v2237_v37 = vadd.f32 %v686_v24, %v676_v32  ;;  %v695_v43 = vmax.f32 %v2235_v34, 0.0  ;;  %v837_v24 = vld [vmem:[#allocation8 + $0x1f0] sm:$0xff]  ;;  %v1201_v34 = vld [vmem:[#allocation10 + $0x168] sm:$0xff] }
 0x218   : > { %v829_v32 = vld [vmem:[#allocation8 + $0x1b0] sm:$0xff] }
 0x219   : > { %v696_v41 = vmax.f32 %v2237_v37, 0.0  ;;  %v1219_v37 = vld [vmem:[#allocation10 + $0x1f8] sm:$0xff] }
 0x21b   : > { %726 = vmatprep.subr.mxu1 %v696_v41 }
 0x21c   : > { %727 = vmatpush1.msra.mxu1 %v695_v43 }
 0x21d   : > { %728 = vmatprep.subr.mxu1 %v694_v45 }
 0x21e   : > { %729 = vmatpush1.msra.mxu1 %v693_v47 }
 0x21f   : > { %1543 = vmatmul.mubr.msk.f32.vlgmr.msra.gmra.mxu1 %vm412_vm0, %v2211_v2  ;;  %981 = vmatprep.subr.mxu1 %v806_v48  ;;  %v819_v48 = vld [vmem:[#allocation8 + $0x160] sm:$0xff] }
 0x220   : > { %982 = vmatpush1.msra.mxu1 %v805_v49  ;;  %768 = vmatprep.mubr.f32.mxu1 %v1953_v19  ;;  %v818_v49 = vld [vmem:[#allocation8 + $0x158] sm:$0xff] }
 0x221   : > { %983 = vmatprep.subr.mxu1 %v804_v50  ;;  %v817_v50 = vld [vmem:[#allocation8 + $0x150] sm:$0xff] }
 0x222   : > { %984 = vmatpush1.msra.mxu1 %v803_v52  ;;  %v815_v52 = vld [vmem:[#allocation8 + $0x140] sm:$0xff] }
 0x223   : > { %1544 = vmatmul.mubr.msk.f32.gmra.mxu1 %vm412_vm0, %v2215_v3  ;;  %985 = vmatprep.subr.mxu1 %v802_v53  ;;  %v814_v53 = vld [vmem:[#allocation8 + $0x138] sm:$0xff] }
 0x224   : > { %986 = vmatpush1.msra.mxu1 %v801_v54  ;;  %1045 = vmatprep.mubr.f32.mxu1 %v694_v45  ;;  %v821_v45 = vld [vmem:[#allocation8 + $0x170] sm:$0xff] }
 0x225   : > { %987 = vmatprep.subr.mxu1 %v800_v55  ;;  %v813_v54 = vld [vmem:[#allocation8 + $0x130] sm:$0xff]  ;;  %v812_v55 = vld [vmem:[#allocation8 + $0x128] sm:$0xff] }
 0x226   : > { %988 = vmatpush1.msra.mxu1 %v799_v56  ;;  %v811_v56 = vld [vmem:[#allocation8 + $0x120] sm:$0xff] }
 0x227   : > { %989 = vmatprep.subr.mxu1 %v798_v57  ;;  %v810_v57 = vld [vmem:[#allocation8 + $0x118] sm:$0xff] }
 0x228   : > { %990 = vmatpush1.msra.mxu1 %v797_v58  ;;  %v809_v58 = vld [vmem:[#allocation8 + $0x110] sm:$0xff] }
 0x229   : > { %991 = vmatprep.subr.mxu1 %v796_v59  ;;  %v808_v59 = vld [vmem:[#allocation8 + $0x108] sm:$0xff] }
 0x22a   : > { %992 = vmatpush1.msra.mxu1 %v795_v60  ;;  %v807_v60 = vld [vmem:[#allocation8 + $0x100] sm:$0xff] }
 0x22b   : > { %993 = vmatprep.subr.mxu1 %v794_v61  ;;  %v875_v61 = vld [vmem:[#allocation8 + $0x318] sm:$0xff] }
 0x22c   : > { %994 = vmatpush1.msra.mxu1 %v793_v62  ;;  %964 = vmatprep.subr.mxu0 %v875_v61  ;;  %v874_v62 = vld [vmem:[#allocation8 + $0x310] sm:$0xff] }
 0x22d   : > { %995 = vmatprep.subr.mxu1 %v792_v63  ;;  %965 = vmatpush2.msra.mxu0 %v874_v62  ;;  %v873_v63 = vld [vmem:[#allocation8 + $0x308] sm:$0xff]  ;;  %v1185_v61 = vld [vmem:[#allocation10 + $0xf0] sm:$0xff] }
 0x22e   : > { %996 = vmatpush1.msra.mxu1 %v791_v0  ;;  %966 = vmatprep.subr.mxu0 %v873_v63  ;;  %v872_v0 = vld [vmem:[#allocation8 + $0x300] sm:$0xff]  ;;  %v1169_v62 = vld [vmem:[#allocation10 + $0x70] sm:$0xff]  ;;  %v1184_v63 = vld [vmem:[#allocation10 + $0xe8] sm:$0xff] }
 0x22f   : > { %997 = vmatprep.subr.mxu1 %v790_v1  ;;  %967 = vmatpush2.msra.mxu0 %v872_v0  ;;  %v1168_v0 = vld [vmem:[#allocation10 + $0x68] sm:$0xff] }
 0x230   : > { %998 = vmatpush1.msra.mxu1 %v789_v4 }
 0x231   : > { %999 = vmatprep.subr.mxu1 %v788_v5 }
 0x232   : > { %1000 = vmatpush1.msra.mxu1 %v787_v7  ;;  %v1202_v7 = vld [vmem:[#allocation10 + $0x170] sm:$0xff] }
 0x233   : > { %1001 = vmatprep.subr.mxu1 %v786_v8  ;;  %v1217_v8 = vld [vmem:[#allocation10 + $0x1e8] sm:$0xff] }
 0x234   : > { %1002 = vmatpush1.msra.mxu1 %v785_v9  ;;  %v1200_v9 = vld [vmem:[#allocation10 + $0x160] sm:$0xff] }
 0x235   : > { %1003 = vmatprep.subr.mxu1 %v784_v10  ;;  %v1215_v10 = vld [vmem:[#allocation10 + $0x1d8] sm:$0xff] }
 0x236   : > { %1004 = vmatpush1.msra.mxu1 %v783_v11  ;;  %v1199_v11 = vld [vmem:[#allocation10 + $0x158] sm:$0xff] }
 0x237   : > { %1005 = vmatprep.subr.mxu1 %v782_v13  ;;  %v1214_v13 = vld [vmem:[#allocation10 + $0x1d0] sm:$0xff] }
 0x238   : > { %1006 = vmatpush1.msra.mxu1 %v781_v15  ;;  %v1198_v15 = vld [vmem:[#allocation10 + $0x150] sm:$0xff] }
 0x239   : > { %1007 = vmatprep.subr.mxu1 %v780_v16  ;;  %v1213_v16 = vld [vmem:[#allocation10 + $0x1c8] sm:$0xff] }
 0x23a   : > { %1008 = vmatpush1.msra.mxu1 %v779_v17  ;;  %v1197_v17 = vld [vmem:[#allocation10 + $0x148] sm:$0xff] }
 0x23b   : > { %1009 = vmatprep.subr.mxu1 %v778_v18  ;;  %v1212_v18 = vld [vmem:[#allocation10 + $0x1c0] sm:$0xff] }
 0x23c   : > { %1010 = vmatpush1.msra.mxu1 %v777_v20  ;;  %v1196_v20 = vld [vmem:[#allocation10 + $0x140] sm:$0xff] }
 0x23d   : > { %1011 = vmatprep.subr.mxu1 %v776_v21  ;;  %v1211_v21 = vld [vmem:[#allocation10 + $0x1b8] sm:$0xff] }
 0x23e   : > { %1012 = vmatpush1.msra.mxu1 %v775_v22  ;;  %v1195_v22 = vld [vmem:[#allocation10 + $0x138] sm:$0xff] }
 0x23f   : > { %1013 = vmatprep.subr.mxu1 %v838_v23  ;;  %v1210_v23 = vld [vmem:[#allocation10 + $0x1b0] sm:$0xff] }
 0x240   : > { %1014 = vmatpush2.msra.mxu1 %v837_v24  ;;  %v1194_v24 = vld [vmem:[#allocation10 + $0x130] sm:$0xff] }
 0x241   : > { %1015 = vmatprep.subr.mxu1 %v836_v25  ;;  %v1209_v25 = vld [vmem:[#allocation10 + $0x1a8] sm:$0xff] }
 0x242   : > { %1016 = vmatpush2.msra.mxu1 %v835_v26  ;;  %v1193_v26 = vld [vmem:[#allocation10 + $0x128] sm:$0xff] }
 0x243   : > { %1017 = vmatprep.subr.mxu1 %v834_v27  ;;  %v1208_v27 = vld [vmem:[#allocation10 + $0x1a0] sm:$0xff] }
 0x244   : > { %1018 = vmatpush2.msra.mxu1 %v833_v28  ;;  %v1192_v28 = vld [vmem:[#allocation10 + $0x120] sm:$0xff] }
 0x245   : > { %1019 = vmatprep.subr.mxu1 %v832_v29  ;;  %v1207_v29 = vld [vmem:[#allocation10 + $0x198] sm:$0xff] }
 0x246   : > { %1020 = vmatpush2.msra.mxu1 %v831_v30  ;;  %v1191_v30 = vld [vmem:[#allocation10 + $0x118] sm:$0xff] }
 0x247   : > { %1021 = vmatprep.subr.mxu1 %v830_v31  ;;  %v1206_v31 = vld [vmem:[#allocation10 + $0x190] sm:$0xff] }
 0x248   : > { %1022 = vmatpush2.msra.mxu1 %v829_v32  ;;  %v1190_v32 = vld [vmem:[#allocation10 + $0x110] sm:$0xff] }
 0x249   : > { %1023 = vmatprep.subr.mxu1 %v828_v33 }
 0x24a   : > { %1024 = vmatpush2.msra.mxu1 %v827_v35 }
 0x24b   : > { %1025 = vmatprep.subr.mxu1 %v826_v36 }
 0x24c   : > { %1026 = vmatpush2.msra.mxu1 %v825_v38 }
 0x24d   : > { %1027 = vmatprep.subr.mxu1 %v824_v40 }
 0x24e   : > { %1028 = vmatpush2.msra.mxu1 %v823_v42  ;;  %v697_v42 = vld [vmem:[%s2353_s5] sm:$0x3] }
 0x24f   : > { %1029 = vmatprep.subr.mxu1 %v822_v44 }
 0x250   : > { %1030 = vmatpush2.msra.mxu1 %v821_v45 }
 0x251   : > { %1031 = vmatprep.subr.mxu1 %v820_v46  ;;  %v1066_v46 = vrot.slane %v697_v42, %v685_v12 }
 0x252   : > { %1032 = vmatpush2.msra.mxu1 %v819_v48 }
 0x253   : > { %1033 = vmatprep.subr.mxu1 %v818_v49 }
 0x254   : > { %1034 = vmatpush2.msra.mxu1 %v817_v50 }
 0x255   : > { %1035 = vmatprep.subr.mxu1 %v816_v51  ;;  %v1062_v51 = vrot.slane %v697_v42, %v681_v14  ;;  %v1186_v14 = vld [vmem:[#allocation10 + $0xf8] sm:$0xff] }
 0x256   : > { %1036 = vmatpush2.msra.mxu1 %v815_v52 }
 0x257   : > { %1037 = vmatprep.subr.mxu1 %v814_v53 }
 0x258   : > { %1038 = vmatpush2.msra.mxu1 %v813_v54 }
 0x259   : > { %1039 = vmatprep.subr.mxu1 %v812_v55 }
 0x25a   : > { %1040 = vmatpush2.msra.mxu1 %v811_v56 }
 0x25b   : > { %1041 = vmatprep.subr.mxu1 %v810_v57 }
 0x25c   : > { %1042 = vmatpush2.msra.mxu1 %v809_v58 }
 0x25d   : > { %1043 = vmatprep.subr.mxu1 %v808_v59 }
 0x25e   : > { %1044 = vmatpush2.msra.mxu1 %v807_v60  ;;  %v1170_v60 = vld [vmem:[#allocation10 + $0x78] sm:$0xff] }
 0x25f   : > { %1046 = vmatmul.mubr.f32.vlgmr.msra.gmra.mxu1 %v693_v47  ;;  %v1218_v47 = vld [vmem:[#allocation10 + $0x1f0] sm:$0xff]  ;;  %1560 = vmatprep.subr.mxu1 %v1219_v37 }
 0x260   : > { %1051 = vmatprep.mubr.f32.mxu1 %v696_v41  ;;  %v1203_v41 = vld [vmem:[#allocation10 + $0x178] sm:$0xff]  ;;  %v1165_v37 = vld [vmem:[#allocation10 + $0x50] sm:$0xff] }
 0x261   : > { %1561 = vmatpush3.msra.mxu1 %v1203_v41  ;;  %v1164_v41 = vld [vmem:[#allocation10 + $0x48] sm:$0xff] }
 0x262   : > { %1562 = vmatprep.subr.mxu1 %v1218_v47  ;;  %v1179_v47 = vld [vmem:[#allocation10 + $0xc0] sm:$0xff] }
 0x263   : > { %1052 = vmatmul.mubr.f32.gmra.mxu1 %v695_v43  ;;  %v1216_v43 = vld [vmem:[#allocation10 + $0x1e0] sm:$0xff] }
 0x264   : > { %1563 = vmatpush3.msra.mxu1 %v1202_v7  ;;  %v1163_v7 = vld [vmem:[#allocation10 + $0x40] sm:$0xff] }
 0x265   : > { %1564 = vmatprep.subr.mxu1 %v1217_v8  ;;  %v1162_v8 = vld [vmem:[#allocation10 + $0x38] sm:$0xff] }
 0x266   : > { %1565 = vmatpush3.msra.mxu1 %v1201_v34  ;;  %v1177_v34 = vld [vmem:[#allocation10 + $0xb0] sm:$0xff] }
 0x267   : > { %1566 = vmatprep.subr.mxu1 %v1216_v43  ;;  %v1161_v43 = vld [vmem:[#allocation10 + $0x30] sm:$0xff] }
 0x268   : > { %1567 = vmatpush3.msra.mxu1 %v1200_v9  ;;  %v1176_v9 = vld [vmem:[#allocation10 + $0xa8] sm:$0xff] }
 0x269   : > { %1568 = vmatprep.subr.mxu1 %v1215_v10  ;;  %v1160_v10 = vld [vmem:[#allocation10 + $0x28] sm:$0xff] }
 0x26a   : > { %1569 = vmatpush3.msra.mxu1 %v1199_v11  ;;  %v1175_v11 = vld [vmem:[#allocation10 + $0xa0] sm:$0xff] }
 0x26b   : > { %1570 = vmatprep.subr.mxu1 %v1214_v13  ;;  %v1159_v13 = vld [vmem:[#allocation10 + $0x20] sm:$0xff] }
 0x26c   : > { %1571 = vmatpush3.msra.mxu1 %v1198_v15  ;;  %v1174_v15 = vld [vmem:[#allocation10 + $0x98] sm:$0xff] }
 0x26d   : > { %1572 = vmatprep.subr.mxu1 %v1213_v16  ;;  %v1158_v16 = vld [vmem:[#allocation10 + $0x18] sm:$0xff] }
 0x26e   : > { %1573 = vmatpush3.msra.mxu1 %v1197_v17  ;;  %v1173_v17 = vld [vmem:[#allocation10 + $0x90] sm:$0xff] }
 0x26f   : > { %1574 = vmatprep.subr.mxu1 %v1212_v18  ;;  %v1157_v18 = vld [vmem:[#allocation10 + $0x10] sm:$0xff] }
 0x270   : > { %1575 = vmatpush3.msra.mxu1 %v1196_v20  ;;  %v1172_v20 = vld [vmem:[#allocation10 + $0x88] sm:$0xff] }
 0x271   : > { %1576 = vmatprep.subr.mxu1 %v1211_v21  ;;  %v1156_v21 = vld [vmem:[#allocation10 + $0x8] sm:$0xff] }
 0x272   : > { %1577 = vmatpush3.msra.mxu1 %v1195_v22  ;;  %v1171_v22 = vld [vmem:[#allocation10 + $0x80] sm:$0xff] }
 0x273   : > { %1578 = vmatprep.subr.mxu1 %v1210_v23  ;;  %v1155_v23 = vld [vmem:[#allocation10] sm:$0xff] }
 0x274   : > { %1579 = vmatpush3.msra.mxu1 %v1194_v24  ;;  %v1205_v24 = vld [vmem:[#allocation10 + $0x188] sm:$0xff] }
 0x275   : > { %1580 = vmatprep.subr.mxu1 %v1209_v25  ;;  %v1189_v25 = vld [vmem:[#allocation10 + $0x108] sm:$0xff] }
 0x276   : > { %1581 = vmatpush3.msra.mxu1 %v1193_v26  ;;  %v1204_v26 = vld [vmem:[#allocation10 + $0x180] sm:$0xff] }
 0x277   : > { %1582 = vmatprep.subr.mxu1 %v1208_v27  ;;  %v1188_v27 = vld [vmem:[#allocation10 + $0x100] sm:$0xff] }
 0x278   : > { %1583 = vmatpush3.msra.mxu1 %v1192_v28 }
 0x279   : > { %1584 = vmatprep.subr.mxu1 %v1207_v29 }
 0x27a   : > { %1585 = vmatpush3.msra.mxu1 %v1191_v30 }
 0x27b   : > { %1586 = vmatprep.subr.mxu1 %v1206_v31 }
 0x27c   : > { %1587 = vmatpush3.msra.mxu1 %v1190_v32 }
 0x27d   : > { %1588 = vmatprep.subr.mxu1 %v1205_v24 }
 0x27e   : > { %1589 = vmatpush3.msra.mxu1 %v1189_v25 }
 0x27f   : > { %1590 = vmatprep.subr.mxu1 %v1204_v26 }
 0x280   : > { %1591 = vmatpush3.msra.mxu1 %v1188_v27 }
 0x2df   : > { %v764_v1 = vpop.f32.mrf.mxu1 }
 0x2e1   : > { %v766_v4 = vpop.f32.mrf.mxu1 }
 0x2e2   : > { %968 = vmatprep.mubr.f32.mxu0 %v766_v4  ;;  %v1167_v4 = vld [vmem:[#allocation10 + $0x60] sm:$0xff] }
 0x2e3   : > { %v770_v5 = vpop.f32.mrf.mxu1  ;;  %969 = vmatmul.mubr.f32.vlgmr.msra.gmra.mxu0 %v764_v1  ;;  %v1183_v1 = vld [vmem:[#allocation10 + $0xe0] sm:$0xff] }
 0x2e5   : > { %v772_v39 = vpop.f32.mrf.mxu1 }
 0x2e6   : > { %974 = vmatprep.mubr.f32.mxu0 %v772_v39  ;;  %v1181_v39 = vld [vmem:[#allocation10 + $0xd0] sm:$0xff] }
 0x2e7   : > { %975 = vmatmul.mubr.f32.gmra.mxu0 %v770_v5  ;;  %v1182_v5 = vld [vmem:[#allocation10 + $0xd8] sm:$0xff] }
 0x2e8   : > { %1142 = vmatprep.mubr.f32.mxu0 %v1953_v19 }
 0x31f   : > { %v1047_v33 = vpop.f32.mrf.mxu1 }
 0x321   : > { %v1049_v35 = vpop.f32.mrf.mxu1 }
 0x323   : > { %v1053_v38 = vpop.f32.mrf.mxu1 }
 0x325   : > { %v1055_v49 = vpop.f32.mrf.mxu1 }
 0x3a3   : > { %v970_v36 = vpop.f32.mrf.mxu0 }
 0x3a4   : > { %v1048_v50 = vadd.f32 %v1047_v33, %v970_v36 }
 0x3a5   : > { %v972_v40 = vpop.f32.mrf.mxu0 }
 0x3a6   : > { %v1050_v45 = vadd.f32 %v1049_v35, %v972_v40  ;;  %v2273_v57 = vadd.f32 %v1062_v51, %v1048_v50 }
 0x3a7   : > { %v976_v44 = vpop.f32.mrf.mxu0 }
 0x3a8   : > { %v1054_v48 = vadd.f32 %v1053_v38, %v976_v44  ;;  %v1070_v55 = vadd.f32 %v1066_v46, %v1050_v45  ;;  %v1073_v6 = vmax.f32 %v2273_v57, 0.0  ;;  %v1547_v45 = vld [vmem:[%s2355_s7] ss:$0 sm:$0xff] }
 0x3a9   : > { %v978_v52 = vpop.f32.mrf.mxu0 }
 0x3aa   : > { %v1056_v53 = vadd.f32 %v1055_v49, %v978_v52  ;;  %v2269_v54 = vadd.f32 %v1062_v51, %v1054_v48  ;;  %v1074_v12 = vmax.f32 %v1070_v55, 0.0 }
 0x3ac   : > { %v2271_v56 = vadd.f32 %v1066_v46, %v1056_v53  ;;  %v1075_v59 = vmax.f32 %v2269_v54, 0.0 }
 0x3ae   : > { %v1076_v58 = vmax.f32 %v2271_v56, 0.0 }
 0x3b0   : > { %1106 = vmatprep.subr.mxu0 %v1076_v58 }
 0x3b1   : > { %1107 = vmatpush1.msra.mxu0 %v1075_v59 }
 0x3b2   : > { %1108 = vmatprep.subr.mxu0 %v1074_v12 }
 0x3b3   : > { %1109 = vmatpush1.msra.mxu0 %v1073_v6 }
 0x3b4   : > { %1545 = vmatmul.mubr.msk.f32.vlgmr.msra.gmra.mxu0 %vm412_vm0, %v2211_v2  ;;  %1598 = vmatprep.subr.mxu0 %v1186_v14  ;;  %v1166_v2 = vld [vmem:[#allocation10 + $0x58] sm:$0xff] }
 0x3b5   : > { %1599 = vmatpush3.msra.mxu0 %v1170_v60  ;;  %1148 = vmatprep.mubr.f32.mxu0 %v1953_v19  ;;  %v1180_v19 = vld [vmem:[#allocation10 + $0xc8] sm:$0xff] }
 0x3b6   : > { %1600 = vmatprep.subr.mxu0 %v1185_v61 }
 0x3b7   : > { %1601 = vmatpush3.msra.mxu0 %v1169_v62 }
 0x3b8   : > { %1546 = vmatmul.mubr.msk.f32.gmra.mxu0 %vm412_vm0, %v2215_v3  ;;  %1602 = vmatprep.subr.mxu0 %v1184_v63  ;;  %v1178_v3 = vld [vmem:[#allocation10 + $0xb8] sm:$0xff] }
 0x3b9   : > { %1603 = vmatpush3.msra.mxu0 %v1168_v0  ;;  %1359 = vmatprep.mubr.f32.mxu0 %v1074_v12 }
 0x3ba   : > { %1604 = vmatprep.subr.mxu0 %v1183_v1 }
 0x3bb   : > { %1605 = vmatpush3.msra.mxu0 %v1167_v4 }
 0x3bc   : > { %1606 = vmatprep.subr.mxu0 %v1182_v5 }
 0x3bd   : > { %1607 = vmatpush3.msra.mxu0 %v1166_v2 }
 0x3be   : > { %1608 = vmatprep.subr.mxu0 %v1181_v39 }
 0x3bf   : > { %1609 = vmatpush3.msra.mxu0 %v1165_v37 }
 0x3c0   : > { %1610 = vmatprep.subr.mxu0 %v1180_v19 }
 0x3c1   : > { %1611 = vmatpush3.msra.mxu0 %v1164_v41 }
 0x3c2   : > { %1612 = vmatprep.subr.mxu0 %v1179_v47 }
 0x3c3   : > { %1613 = vmatpush3.msra.mxu0 %v1163_v7 }
 0x3c4   : > { %1614 = vmatprep.subr.mxu0 %v1178_v3 }
 0x3c5   : > { %1615 = vmatpush3.msra.mxu0 %v1162_v8 }
 0x3c6   : > { %1616 = vmatprep.subr.mxu0 %v1177_v34 }
 0x3c7   : > { %1617 = vmatpush3.msra.mxu0 %v1161_v43 }
 0x3c8   : > { %1618 = vmatprep.subr.mxu0 %v1176_v9 }
 0x3c9   : > { %1619 = vmatpush3.msra.mxu0 %v1160_v10 }
 0x3ca   : > { %1620 = vmatprep.subr.mxu0 %v1175_v11 }
 0x3cb   : > { %1621 = vmatpush3.msra.mxu0 %v1159_v13 }
 0x3cc   : > { %1622 = vmatprep.subr.mxu0 %v1174_v15 }
 0x3cd   : > { %1623 = vmatpush3.msra.mxu0 %v1158_v16 }
 0x3ce   : > { %1624 = vmatprep.subr.mxu0 %v1173_v17 }
 0x3cf   : > { %1625 = vmatpush3.msra.mxu0 %v1157_v18 }
 0x3d0   : > { %1626 = vmatprep.subr.mxu0 %v1172_v20 }
 0x3d1   : > { %1627 = vmatpush3.msra.mxu0 %v1156_v21 }
 0x3d2   : > { %1628 = vmatprep.subr.mxu0 %v1171_v22 }
 0x3d3   : > { %1629 = vmatpush3.msra.mxu0 %v1155_v23 }
 0x3d4   : > { %1360 = vmatmul.mubr.f32.vlgmr.msra.gmra.mxu0 %v1073_v6 }
 0x3d5   : > { %1364 = vmatprep.mubr.f32.mxu0 %v1076_v58 }
 0x3d8   : > { %1365 = vmatmul.mubr.f32.gmra.mxu0 %v1075_v59 }
 0x474   : > { %v1144_v28 = vpop.f32.mrf.mxu0 }
 0x476   : > { %v1146_v29 = vpop.f32.mrf.mxu0 }
 0x477   : > { %1284 = vmatprep.mubr.f32.mxu1 %v1146_v29 }
 0x478   : > { %v1150_v30 = vpop.f32.mrf.mxu0  ;;  %1285 = vmatmul.mubr.f32.vlgmr.msra.gmra.mxu1 %v1144_v28 }
 0x47a   : > { %v1152_v31 = vpop.f32.mrf.mxu0 }
 0x47b   : > { %1289 = vmatprep.mubr.f32.mxu1 %v1152_v31 }
 0x47c   : > { %1290 = vmatmul.mubr.f32.gmra.mxu1 %v1150_v30 }
 0x494   : > { %v1630_v32 = vpop.f32.mrf.mxu0 }
 0x496   : > { %v1631_v33 = vpop.f32.mrf.mxu0 }
 0x497   : > { %v1632_v40 = vadd.f32 %v1631_v33, %v1630_v32 }
 0x498   : > { %v1633_v35 = vpop.f32.mrf.mxu0 }
 0x49a   : > { %v1634_v44 = vpop.f32.mrf.mxu0 }
 0x49b   : > { %v1635_v50 = vadd.f32 %v1634_v44, %v1633_v35 }
 0x538   : > { %v1592_v36 = vpop.f32.mrf.mxu1 }
 0x53a   : > { %v1593_v38 = vpop.f32.mrf.mxu1 }
 0x53b   : > { %v1594_v42 = vadd.f32 %v1593_v38, %v1592_v36 }
 0x53c   : > { %v1595_v46 = vpop.f32.mrf.mxu1 }
 0x53d   : > { %v1362_v48 = vadd.f32 %v1632_v40, %v1594_v42 }
 0x53e   : > { %v1596_v49 = vpop.f32.mrf.mxu1 }
 0x53f   : > { %v1376_v51 = vadd.f32 %v1547_v45, %v1362_v48  ;;  %v1597_v52 = vadd.f32 %v1596_v49, %v1595_v46 }
 0x541   : > { %1378 = vst [vmem:[%s406_s4] sm:$0xff] %v1376_v51  ;;  %v1367_v53 = vadd.f32 %v1635_v50, %v1597_v52 }
 0x543   : > { %v1377_v54 = vadd.f32 %v1547_v45, %v1367_v53 }
 0x545   : > { %1379 = vst [vmem:[%s406_s4 + $0x8] sm:$0xff] %v1377_v54 }
 0x546   : > { %1879 = shalt.err (!%p1876_p13)
}
 0x547   : > { %s1880_s13 = scalar_lea.hbm %s2305_s23, 256  ;;  %s1884_s11 = scalar_lea.hbm %s2356_s8, 512 }
 0x548   : > { %p1881_p6 = scmp.ne.s32.totalorder %s2305_s23, %s1880_s13  ;;  %p1885_p11 = scmp.lt.s32.totalorder %s2305_s23, %s2356_s8 }
 0x549   : > { %p1886_p4 = scmp.lt.s32.totalorder %s1884_s11, %s1880_s13 }
 0x54a   : > { %p1882_p1 = pnand %p1881_p6, %p2392_p5 }
 0x54b   : > { %p1887_p12 = por %p1886_p4, %p1885_p11 }
 0x54c   : > { %p1883_p8 = pneg %p1882_p1 }
 0x54e   : > { %p1888_p0 = pnand %p1887_p12, %p1883_p8 }
 0x550   : > { %1891 = shalt.err (!%p1888_p0)
}
 0x551   : > { %s1955_s10 = smov 128   ;;  %s1956_s21 = smov 8  }
 0x552   : > { %1659 = dma.vmem_to_hbm [thread:$0]  (%p2392_p5), %s2300_s18, 256, %s2305_s23, %s1381_s15, %s1955_s10, %s1955_s10, %s1956_s21  }
 0x553 PF: > { %s1409_s17 = sand.u32 1, %s1930_s27   ;;  %p2393_p3 = scmp.ne.s32.totalorder %s2373_s12, 0 }
 0x554   : > { %p2394_p7 = scmp.ge.s32.totalorder %s1942_s30, 2  ;;  %s1410_s4 = scalar_lea.sflag [#allocation4], %s1409_s17 }
 0x556   : > { %p1679_p9 = pnand %p2394_p7, %p2393_p3 }
 0x558   : > { %p1680_p2 = pneg %p1679_p9 }
 0x55a   : > { %1925 = dma.done.wait (%p1680_p2), %s1410_s4, 256  }
 0x55b   : > { %1927 = vsyncadd (%p1680_p2), %s1410_s4, 4294967040  ;;  %s2395_s30 = sld [smem:[#allocation18_spill]]  ;;  %s2398_s27 = smov %s1934_s28 }
 0x55c   : > { %s2396_s26 = sld [smem:[#allocation17_spill]] }
 0x55d   : > { %s2397_s29 = sld [smem:[#allocation19_spill]] }
 0x561   : > { %p25_p10 = scmp.ge.s32.totalorder %s2395_s30, 4  }
 0x562   : > { %s2399_s28 = smov %s2396_s26 }
 0x563   :  { %27 = sbr.rel (!%p25_p10) target bundleno = 13 (0xd), region = 125 }
 0x568   :  { %1415 = vsyncpa [#allocation3], 1 }
 0x569   :  { %1417 = vsyncpa [#allocation3 + $0x1], 1 }
 0x56a   :  { %1418 = vsyncpa [#allocation6], 1 }
 0x56b   :  { %1420 = vsyncpa [#allocation6 + $0x1], 1 }
 0x56c   :  { %1421 = vsyncpa [#allocation9], 1 }
 0x56d   :  { %1422 = vsyncpa [#allocation4], 1 }
 0x56e   :  { %1424 = vsyncpa [#allocation4 + $0x1], 1 }

// kernel: tpu_custom_call.1
= control target key start
LH: loop header
LB: loop body
LE: loop exit
PB: predicated region body
PF: predicated region fallthrough
CT: control target
= control target key end

     0   :  { %s2348_s0 = inlined_call_operand.hbm [shape: f32[2,16,16], index: 0, kind: input, shape index: {}]   ;;  %s2349_s1 = inlined_call_operand.hbm [shape: f32[2,16,128], index: 1, kind: input, shape index: {}]   ;;  %s2350_s2 = inlined_call_operand.hbm [shape: f32[2,32,256], index: 2, kind: input, shape index: {}]   ;;  %s2351_s3 = inlined_call_operand.vmem [shape: f32[1,256], index: 3, kind: input, shape index: {}]   ;;  %s2352_s4 = inlined_call_operand.hbm [shape: f32[2,256,256], index: 4, kind: input, shape index: {}]   ;;  %s2353_s5 = inlined_call_operand.vmem [shape: f32[1,1,256], index: 5, kind: input, shape index: {}]   ;;  %s2354_s6 = inlined_call_operand.hbm [shape: f32[2,256,128], index: 6, kind: input, shape index: {}]   ;;  %s2355_s7 = inlined_call_operand.vmem [shape: f32[1,128], index: 7, kind: input, shape index: {}]   ;;  %s2356_s8 = inlined_call_operand.hbm [shape: f32[2,16,128], index: 8, kind: output, shape index: {}]  }
   0x1   :  { %2367 = sst [smem:[#allocation20_spill]] %s2348_s0 }
   0x2   :  { %2368 = sst [smem:[#allocation21_spill]] %s2350_s2 }
   0x3   :  { %2369 = sst [smem:[#allocation22_spill]] %s2352_s4 }
   0x4   :  { %2370 = sst [smem:[#allocation23_spill]] %s2354_s6 }
   0x5   :  { %13 = vsyncpa [#allocation3], 0 }
   0x6   :  { %15 = vsyncpa [#allocation3 + $0x1], 0 }
   0x7   :  { %16 = vsyncpa [#allocation6], 0 }
   0x8   :  { %18 = vsyncpa [#allocation6 + $0x1], 0 }
   0x9   :  { %19 = vsyncpa [#allocation9], 0 }
   0xa   :  { %20 = vsyncpa [#allocation4], 0 }
   0xb   :  { %22 = vsyncpa [#allocation4 + $0x1], 0  ;;  %s2002_s27 = smov 0   ;;  %s2004_s28 = smov 0  }
   0xc   :  { %s2006_s29 = smov 0   ;;  %s2008_s30 = smov 0  }
   0xd LB: > { %2371 = sst [smem:[#allocation17_spill]] %s1938_s29  ;;  %s2023_s9 = sadd.s32 4294967295, %s1942_s30   ;;  %s1942_s30 = sphi %s2008_s30, %s2395_s30   ;;  %s1938_s29 = sphi %s2006_s29, %s2397_s29   ;;  %s1934_s28 = sphi %s2004_s28, %s2399_s28   ;;  %s1930_s27 = sphi %s2002_s27, %s2398_s27  }
   0xe   : > { %s1518_s10 = sadd.s32 4294967294, %s1942_s30   ;;  %p48_p0 = scmp.ne.s32.totalorder %s1934_s28, %s1930_s27 }
   0xf   : > { %p2357_p1 = scmp.eq.s32.totalorder %s2023_s9, 0  ;;  %p230_p3 = scmp.eq.s32.totalorder %s1518_s10, 1 }
  0x10   : > { %p1519_p5 = scmp.ge.s32.totalorder %s1942_s30, 1  ;;  %p237_p7 = scmp.lt.s32.totalorder %s1942_s30, 3 }
  0x11   : > { %p2032_p4 = por %p2357_p1, %p48_p0  ;;  %p2037_p6 = por %p230_p3, %p48_p0 }
  0x12   : > { %p2042_p8 = pnand %p1519_p5, %p237_p7  ;;  %s1944_s14 = smov [#allocation7]  }
  0x13   : > { %s2372_s11 = scalar_select %p2032_p4, 1, 0 }
  0x14   : > { %s2373_s12 = scalar_select %p2037_p6, 1, 0 }
  0x15   : > { %s249_s15 = sshll.u32 %s1944_s14, 4  ;;  %p1661_p9 = pneg %p2042_p8  ;;  %s250_s15 = int_to_ptr.vmem [resolvable:$true] %s249_s15 }
  0x16   : > { %s1945_s17 = smov [#allocation8]   ;;  %s1946_s19 = smov [#allocation10]  }
  0x17   : > { %p2051_p11 = pnand %p1661_p9, %p2357_p1  ;;  %s265_s18 = sshll.u32 %s1945_s17, 4  ;;  %s266_s18 = int_to_ptr.vmem [resolvable:$true] %s265_s18 }
  0x18   : > { %s281_s20 = sshll.u32 %s1946_s19, 4  ;;  %s1743_s21 = scalar_lea.vmem %s250_s15, 2048  ;;  %s282_s20 = int_to_ptr.vmem [resolvable:$true] %s281_s20 }
  0x19   : > { %p1734_p12 = pneg %p2051_p11  ;;  %p1744_p13 = scmp.ne.s32.totalorder %s250_s15, %s1743_s21 }
  0x1a   : > { %p1751_p5 = scmp.lt.s32.totalorder %s250_s15, %s250_s15  ;;  %p1752_p7 = scmp.lt.s32.totalorder %s1743_s21, %s1743_s21 }
  0x1b   : > { %p1746_p0 = pnand %p1744_p13, %p1734_p12 }
  0x1c   : > { %p1753_p9 = por %p1752_p7, %p1751_p5 }
  0x1d   : > { %p1747_p3 = pneg %p1746_p0 }
  0x1f   : > { %p1754_p10 = pnand %p1753_p9, %p1747_p3 }
  0x21   : > { %1757 = shalt.err (!%p1754_p10)
}
  0x22   : > { %s1947_s22 = smov 256   ;;  %s1948_s23 = smov 16  }
  0x23   : > { %s2376_s2 = sld [smem:[#allocation21_spill]]  ;;  %s1769_s26 = scalar_lea.vmem %s266_s18, 16384 }
  0x24   : > { %p1770_p1 = scmp.ne.s32.totalorder %s266_s18, %s1769_s26  ;;  %p1777_p2 = scmp.lt.s32.totalorder %s266_s18, %s266_s18 }
  0x25   : > { %p1778_p6 = scmp.lt.s32.totalorder %s1769_s26, %s1769_s26 }
  0x26   : > { %p1772_p13 = pnand %p1770_p1, %p1734_p12 }
  0x27   : > { %p1779_p5 = por %p1778_p6, %p1777_p2 }
  0x28   : > { %p1773_p0 = pneg %p1772_p13 }
  0x29   : > { %1664 = dma.hbm_to_vmem [thread:$0]  (!%p2051_p11), %s2376_s2, 2048, %s250_s15, [#allocation6], %s1947_s22, %s1947_s22, %s1948_s23  }
  0x2a   : > { %p1780_p3 = pnand %p1779_p5, %p1773_p0 }
  0x2c   : > { %1783 = shalt.err (!%p1780_p3)
}
  0x2d   : > { %s2377_s4 = sld [smem:[#allocation22_spill]]  ;;  %s1795_s15 = scalar_lea.vmem %s282_s20, 8192 }
  0x2e   : > { %p1796_p10 = scmp.ne.s32.totalorder %s282_s20, %s1795_s15  ;;  %p1803_p9 = scmp.lt.s32.totalorder %s282_s20, %s282_s20 }
  0x2f   : > { %p1804_p13 = scmp.lt.s32.totalorder %s1795_s15, %s1795_s15 }
  0x30   : > { %p1798_p7 = pnand %p1796_p10, %p1734_p12 }
  0x31   : > { %p1805_p4 = por %p1804_p13, %p1803_p9 }
  0x32   : > { %p1799_p1 = pneg %p1798_p7 }
  0x33   : > { %1667 = dma.hbm_to_vmem [thread:$0]  (!%p2051_p11), %s2377_s4, 16384, %s266_s18, [#allocation9], %s1947_s22, %s1947_s22, %s1948_s23  }
  0x34   : > { %p1806_p2 = pnand %p1805_p4, %p1799_p1 }
  0x36   : > { %1809 = shalt.err (!%p1806_p2)
}
  0x37   : > { %s2359_s17 = smov 128   ;;  %s2361_s18 = smov 8  }
  0x38   : > { %s2378_s6 = sld [smem:[#allocation23_spill]]  ;;  %s2085_s22 = sadd.s32 1, %s1942_s30  }
  0x39   : > { %2379 = sst [smem:[#allocation18_spill]] %s2085_s22  ;;  %s32_s23 = ssub.s32 %s1942_s30, %s2085_s22 }
  0x3a   : > { %s35_s24 = sadd.s32 1, %s1938_s29  ;;  %p33_p4 = scmp.eq.s32.totalorder %s32_s23, 0 }
  0x3b   : > { %p42_p6 = scmp.ne.s32.totalorder %s1938_s29, %s1934_s28  ;;  %p43_p12 = scmp.eq.s32.totalorder %s1942_s30, 0 }
  0x3c   : > { %p1685_p0 = scmp.lt.s32.totalorder %s1942_s30, 2  ;;  %p2381_p3 = scmp.eq.s32.totalorder %s2023_s9, 1 }
  0x3d   : > { %s2095_s25 = scalar_select %p33_p4, %s1938_s29, %s35_s24  }
  0x3e   : > { %1670 = dma.hbm_to_vmem [thread:$0]  (!%p2051_p11), %s2378_s6, 8192, %s282_s20, [#allocation9], %s2359_s17, %s2359_s17, %s2361_s18  }
  0x3f   : > { %2380 = sst [smem:[#allocation19_spill]] %s2095_s25  ;;  %p44_p5 = por %p43_p12, %p42_p6 }
  0x40   : > { %p2099_p10 = por %p2381_p3, %p42_p6  ;;  %s298_s26 = sand.u32 1, %s1938_s29  }
  0x41   : > { %s1553_s10 = sshll.u32 %s1942_s30, 8  ;;  %s2105_s20 = sshll.u32 %s298_s26, 4 }
  0x42   : > { %s2382_s16 = scalar_select %p2099_p10, 1, 0 }
  0x43   : > { %s2383_s0 = sld [smem:[#allocation20_spill]]  ;;  %s302_s21 = scalar_lea.vmem [#allocation2], %s2105_s20 }
  0x44   : > { %s309_s23 = sshll.u32 %s302_s21, 4  ;;  %p2113_p11 = pnand %p1685_p0, %p44_p5  ;;  %s2117_s23 = int_to_ptr.vmem [resolvable:$true] %s309_s23 }
  0x45   : > { %s2122_s14 = scalar_lea.hbm %s2349_s1, %s1553_s10  ;;  %s2124_s15 = scalar_lea.sflag [#allocation3], %s298_s26 }
  0x46   : > { %p1812_p1 = pneg %p2113_p11 }
  0x49   : > { %s2110_s19 = scalar_lea.hbm %s2383_s0, %s1553_s10  ;;  %s1815_s6 = scalar_lea.hbm %s2383_s0, 512 }
  0x4a   : > { %s1810_s2 = scalar_lea.hbm %s2110_s19, 256  ;;  %p1816_p2 = scmp.lt.s32.totalorder %s2110_s19, %s2383_s0 }
  0x4b   : > { %p1811_p7 = scmp.ne.s32.totalorder %s2110_s19, %s1810_s2  ;;  %p1817_p4 = scmp.lt.s32.totalorder %s1815_s6, %s1810_s2 }
  0x4d   : > { %p1813_p9 = pnand %p1812_p1, %p1811_p7  ;;  %p1818_p6 = por %p1817_p4, %p1816_p2 }
  0x4f   : > { %p1814_p13 = pneg %p1813_p9 }
  0x51   : > { %p1819_p12 = pnand %p1818_p6, %p1814_p13 }
  0x53   : > { %1822 = shalt.err (!%p1819_p12)
}
  0x54   : > { %s1823_s17 = scalar_lea.vmem %s2117_s23, 256  ;;  %s1951_s4 = smov [#allocation2]  }
  0x55   : > { %p1824_p0 = scmp.ne.s32.totalorder %s2117_s23, %s1823_s17  ;;  %s1828_s18 = sshll.u32 %s1951_s4, 4  ;;  %s1829_s18 = int_to_ptr.vmem [resolvable:$false] %s1828_s18 }
  0x56   : > { %s1830_s26 = scalar_lea.vmem %s1829_s18, 512  ;;  %p1831_p7 = scmp.lt.s32.totalorder %s2117_s23, %s1829_s18 }
  0x57   : > { %p1826_p5 = pnand %p1824_p0, %p1812_p1  ;;  %p1832_p9 = scmp.lt.s32.totalorder %s1830_s26, %s1823_s17 }
  0x59   : > { %p1827_p3 = pneg %p1826_p5  ;;  %p1833_p10 = por %p1832_p9, %p1831_p7 }
  0x5b   : > { %p1834_p2 = pnand %p1833_p10, %p1827_p3 }
  0x5d   : > { %1837 = shalt.err (!%p1834_p2)
}
  0x5e   : > { %s2385_s2 = smov 8   ;;  %s2386_s6 = smov 128  }
  0x5f   : > { %1674 = dma.hbm_to_vmem [thread:$0]  (!%p2113_p11), %s2110_s19, 256, %s2117_s23, %s2124_s15, %s2386_s6, %s2386_s6, %s2385_s2  }
  0x60   : > { %s323_s29 = scalar_lea.vmem [#allocation5], %s2105_s20  ;;  %s319_s10 = sand.u32 1, %s1942_s30  }
  0x61   : > { %s330_s25 = sshll.u32 %s323_s29, 4  ;;  %s320_s21 = scalar_lea.sflag [#allocation6], %s319_s10  ;;  %s2156_s25 = int_to_ptr.vmem [resolvable:$true] %s330_s25 }
  0x62   : > { %s1838_s17 = scalar_lea.hbm %s2122_s14, 256  ;;  %s1843_s26 = scalar_lea.hbm %s2349_s1, 512 }
  0x63   : > { %p1839_p10 = scmp.ne.s32.totalorder %s2122_s14, %s1838_s17  ;;  %p1844_p6 = scmp.lt.s32.totalorder %s2122_s14, %s2349_s1 }
  0x64   : > { %p1845_p12 = scmp.lt.s32.totalorder %s1843_s26, %s1838_s17 }
  0x65   : > { %p1841_p13 = pnand %p1839_p10, %p1812_p1 }
  0x66   : > { %p1846_p0 = por %p1845_p12, %p1844_p6 }
  0x67   : > { %p1842_p4 = pneg %p1841_p13 }
  0x69   : > { %p1847_p5 = pnand %p1846_p0, %p1842_p4 }
  0x6b   : > { %1850 = shalt.err (!%p1847_p5)
}
  0x6c   : > { %s1851_s20 = scalar_lea.vmem %s2156_s25, 256  ;;  %s1952_s19 = smov [#allocation5]  }
  0x6d   : > { %p1852_p3 = scmp.ne.s32.totalorder %s2156_s25, %s1851_s20  ;;  %s1856_s23 = sshll.u32 %s1952_s19, 4  ;;  %s1857_s23 = int_to_ptr.vmem [resolvable:$false] %s1856_s23 }
  0x6e   : > { %s1858_s15 = scalar_lea.vmem %s1857_s23, 512  ;;  %p1859_p2 = scmp.lt.s32.totalorder %s2156_s25, %s1857_s23 }
  0x6f   : > { %p1854_p7 = pnand %p1852_p3, %p1812_p1  ;;  %p1860_p10 = scmp.lt.s32.totalorder %s1858_s15, %s1851_s20 }
  0x71   : > { %p1855_p9 = pneg %p1854_p7  ;;  %p1861_p13 = por %p1860_p10, %p1859_p2 }
  0x73   : > { %p1862_p6 = pnand %p1861_p13, %p1855_p9 }
  0x75   : > { %1865 = shalt.err (!%p1862_p6)
}
  0x76   : > { %1677 = dma.hbm_to_vmem [thread:$0]  (!%p2113_p11), %s2122_s14, 256, %s2156_s25, %s320_s21, %s2386_s6, %s2386_s6, %s2385_s2  }
  0x77   : > { %342 = sbr.rel (%p2042_p8) target bundleno = 1363 (0x553), region = 52  ;;  %s2186_s0 = sand.u32 (!%p2042_p8), 1, %s1934_s28  }
  0x78   : > { %s2189_s22 = sshll.u32 (!%p2042_p8), %s2186_s0, 4  ;;  %s345_s29 = scalar_lea.sflag (!%p2042_p8), [#allocation3], %s2186_s0 }
  0x79   : > { %s348_s24 = scalar_lea.vmem (!%p2042_p8), [#allocation2], %s2189_s22  ;;  %p2387_p1 = scmp.ne.s32.totalorder (!%p2042_p8), %s2372_s11, 0 }
  0x7c   : > { %1909 = dma.done.wait (%p2387_p1), %s345_s29, 256  }
  0x7d   : > { %1911 = vsyncadd (%p2387_p1), %s345_s29, 4294967040  ;;  %s353_s13 = sand.u32 1, %s2023_s9   ;;  %s357_s2 = scalar_lea.vmem [#allocation5], %s2189_s22 }
  0x7e   : > { %s354_s14 = scalar_lea.sflag [#allocation6], %s353_s13 }
  0x7f   : > { %1913 = dma.done.wait (%p2387_p1), %s354_s14, 256  }
  0x80   : > { %1915 = vsyncadd (%p2387_p1), %s354_s14, 4294967040  ;;  %p2388_p8 = scmp.eq.s32.totalorder %s2023_s9, 0 }
  0x82   : > { %1917 = dma.done.wait (%p2388_p8), [#allocation6], 2048   ;;  %p2389_p11 = pmov %p2388_p8 }
  0x83   : > { %p2390_p4 = pmov %p2388_p8 }
  0x84   : > { %1919 = vsyncadd (%p2389_p11), [#allocation6], 4294965248 }
  0x85   : > { %1921 = dma.done.wait (%p2390_p4), [#allocation9], 24576   ;;  %p2391_p12 = pmov %p2390_p4 }
  0x86   : > { %vm412_vm0 = vcmask 130048   ;;  %v410_v0 = vld [vmem:[%s357_s2 + $0x8] sm:$0xff]  ;;  %v409_v1 = vld [vmem:[%s357_s2] sm:$0xff]  ;;  %vm511_vm1 = vcmask 261120   ;;  %v1953_v19 = vmov 0.0   ;;  %v679_v63 = vlaneseq  ;;  %s406_s4 = scalar_lea.vmem [#allocation11], %s2189_s22 }
  0x87   : > { %1923 = vsyncadd (%p2391_p12), [#allocation9], 4294942720  ;;  %v2211_v2 = vld [vmem:[%s348_s24] sm:$0xff]  ;;  %1636 = vmatprep.subr.mxu0 %v410_v0  ;;  %v2215_v3 = vld [vmem:[%s348_s24 + $0x8] sm:$0xff]  ;;  %582 = vmatprep.mubr.f32.mxu1 %v1953_v19  ;;  %s1394_s18 = sshll.u32 %s406_s4, 4  ;;  %s1555_s26 = sshll.u32 %s2023_s9, 8  ;;  %s2300_s18 = int_to_ptr.vmem [resolvable:$true] %s1394_s18 }
  0x88   : > { %1640 = vmatprep.mubr.msk.f32.mxu0 %vm412_vm0, %v2211_v2  ;;  %1637 = vmatpush3.msra.mxu0 %v410_v0  ;;  %v501_v4 = vld [vmem:[#allocation7 + $0x38] sm:$0xff]  ;;  %v509_v6 = vld [vmem:[#allocation7 + $0x70] sm:$0xff]  ;;  %v508_v8 = vld [vmem:[#allocation7 + $0x68] sm:$0xff]  ;;  %s2305_s23 = scalar_lea.hbm %s2356_s8, %s1555_s26  ;;  %s1381_s15 = scalar_lea.sflag [#allocation4], %s2186_s0 }
  0x89   : > { %v510_v5 = vld [vmem:[#allocation7 + $0x78] sm:$0xff]  ;;  %1638 = vmatprep.subr.mxu0 %v409_v1  ;;  %v500_v7 = vld [vmem:[#allocation7 + $0x30] sm:$0xff]  ;;  %v499_v9 = vld [vmem:[#allocation7 + $0x28] sm:$0xff]  ;;  %s1866_s22 = scalar_lea.vmem %s2300_s18, 256  ;;  %p2392_p5 = scmp.ne.s32.totalorder %s2382_s16, 0 }
  0x8a   : > { %542 = vmatprep.subr.mxu1 %v510_v5  ;;  %1639 = vmatpush3.msra.mxu0 %v409_v1  ;;  %v507_v10 = vld [vmem:[#allocation7 + $0x60] sm:$0xff]  ;;  %v506_v12 = vld [vmem:[#allocation7 + $0x58] sm:$0xff]  ;;  %v496_v14 = vld [vmem:[#allocation7 + $0x10] sm:$0xff]  ;;  %p1867_p0 = scmp.ne.s32.totalorder %s2300_s18, %s1866_s22  ;;  %s1954_s9 = smov [#allocation11]  }
  0x8b   : > { %543 = vmatpush1.msra.mxu1 %v509_v6  ;;  %1641 = vmatmul.mubr.msk.f32.vlgmr.msra.gmra.mxu0 %vm412_vm0, %v2215_v3  ;;  %v498_v11 = vld [vmem:[#allocation7 + $0x20] sm:$0xff]  ;;  %v497_v13 = vld [vmem:[#allocation7 + $0x18] sm:$0xff]  ;;  %v495_v15 = vld [vmem:[#allocation7 + $0x8] sm:$0xff]  ;;  %v2224_v6 = vshrl.u32 %v679_v63, 7  ;;  %s1870_s29 = sshll.u32 %s1954_s9, 4  ;;  %s1871_s29 = int_to_ptr.vmem [resolvable:$false] %s1870_s29 }
  0x8c   : > { %625 = vmatprep.subr.mxu0 %v501_v4  ;;  %544 = vmatprep.subr.mxu1 %v508_v8  ;;  %v505_v16 = vld [vmem:[#allocation7 + $0x50] sm:$0xff]  ;;  %v494_v17 = vld [vmem:[#allocation7] sm:$0xff]  ;;  %v504_v18 = vld [vmem:[#allocation7 + $0x48] sm:$0xff]  ;;  %p1868_p3 = pnand %p1867_p0, %p2392_p5  ;;  %s1872_s24 = scalar_lea.vmem %s1871_s29, 512 }
  0x8d   : > { %626 = vmatpush1.msra.mxu0 %v500_v7  ;;  %545 = vmatpush1.msra.mxu1 %v507_v10  ;;  %v503_v20 = vld [vmem:[#allocation7 + $0x40] sm:$0xff]  ;;  %v871_v23 = vld [vmem:[#allocation8 + $0x2f8] sm:$0xff]  ;;  %v870_v24 = vld [vmem:[#allocation8 + $0x2f0] sm:$0xff]  ;;  %p1873_p9 = scmp.lt.s32.totalorder %s2300_s18, %s1871_s29  ;;  %p1874_p2 = scmp.lt.s32.totalorder %s1872_s24, %s1866_s22 }
  0x8e   : > { %627 = vmatprep.subr.mxu0 %v499_v9  ;;  %546 = vmatprep.subr.mxu1 %v506_v12  ;;  %v869_v25 = vld [vmem:[#allocation8 + $0x2e8] sm:$0xff]  ;;  %v868_v26 = vld [vmem:[#allocation8 + $0x2e0] sm:$0xff]  ;;  %v867_v27 = vld [vmem:[#allocation8 + $0x2d8] sm:$0xff]  ;;  %v685_v12 = vsub.s32 1, %v2224_v6  ;;  %p1869_p7 = pneg %p1868_p3 }
  0x8f   : > { %628 = vmatpush1.msra.mxu0 %v498_v11  ;;  %547 = vmatpush1.msra.mxu1 %v505_v16  ;;  %v866_v28 = vld [vmem:[#allocation8 + $0x2d0] sm:$0xff]  ;;  %v865_v29 = vld [vmem:[#allocation8 + $0x2c8] sm:$0xff]  ;;  %v864_v30 = vld [vmem:[#allocation8 + $0x2c0] sm:$0xff]  ;;  %p1875_p10 = por %p1874_p2, %p1873_p9 }
  0x90   : > { %629 = vmatprep.subr.mxu0 %v497_v13  ;;  %665 = vmatprep.mubr.f32.mxu0 %v1953_v19  ;;  %v863_v31 = vld [vmem:[#allocation8 + $0x2b8] sm:$0xff]  ;;  %v862_v32 = vld [vmem:[#allocation8 + $0x2b0] sm:$0xff]  ;;  %v861_v33 = vld [vmem:[#allocation8 + $0x2a8] sm:$0xff] }
  0x91   : > { %630 = vmatpush1.msra.mxu0 %v496_v14  ;;  %548 = vmatprep.subr.mxu1 %v504_v18  ;;  %v860_v34 = vld [vmem:[#allocation8 + $0x2a0] sm:$0xff]  ;;  %v859_v35 = vld [vmem:[#allocation8 + $0x298] sm:$0xff]  ;;  %v858_v36 = vld [vmem:[#allocation8 + $0x290] sm:$0xff]  ;;  %v681_v14 = vsub.s32 0, %v2224_v6  ;;  %p1876_p13 = pnand %p1875_p10, %p1869_p7 }
  0x92   : > { %631 = vmatprep.subr.mxu0 %v495_v15  ;;  %549 = vmatpush1.msra.mxu1 %v503_v20  ;;  %v857_v37 = vld [vmem:[#allocation8 + $0x288] sm:$0xff]  ;;  %v856_v38 = vld [vmem:[#allocation8 + $0x280] sm:$0xff]  ;;  %v855_v39 = vld [vmem:[#allocation8 + $0x278] sm:$0xff] }
  0x93   : > { %632 = vmatpush1.msra.mxu0 %v494_v17  ;;  %v854_v40 = vld [vmem:[#allocation8 + $0x270] sm:$0xff]  ;;  %v853_v41 = vld [vmem:[#allocation8 + $0x268] sm:$0xff]  ;;  %v852_v42 = vld [vmem:[#allocation8 + $0x260] sm:$0xff] }
  0x94   : > { %1541 = vmatmul.mubr.msk.f32.vlgmr.msra.gmra.mxu0 %vm511_vm1, %v409_v1  ;;  %904 = vmatprep.subr.mxu0 %v871_v23  ;;  %v851_v43 = vld [vmem:[#allocation8 + $0x258] sm:$0xff]  ;;  %v850_v44 = vld [vmem:[#allocation8 + $0x250] sm:$0xff]  ;;  %v849_v45 = vld [vmem:[#allocation8 + $0x248] sm:$0xff] }
  0x95   : > { %671 = vmatprep.mubr.f32.mxu0 %v1953_v19  ;;  %905 = vmatpush1.msra.mxu0 %v870_v24  ;;  %v848_v46 = vld [vmem:[#allocation8 + $0x240] sm:$0xff]  ;;  %v847_v47 = vld [vmem:[#allocation8 + $0x238] sm:$0xff]  ;;  %v846_v48 = vld [vmem:[#allocation8 + $0x230] sm:$0xff] }
  0x96   : > { %906 = vmatprep.subr.mxu0 %v869_v25  ;;  %v845_v49 = vld [vmem:[#allocation8 + $0x228] sm:$0xff]  ;;  %v844_v50 = vld [vmem:[#allocation8 + $0x220] sm:$0xff]  ;;  %v843_v51 = vld [vmem:[#allocation8 + $0x218] sm:$0xff] }
  0x97   : > { %907 = vmatpush1.msra.mxu0 %v868_v26  ;;  %v842_v52 = vld [vmem:[#allocation8 + $0x210] sm:$0xff]  ;;  %v841_v53 = vld [vmem:[#allocation8 + $0x208] sm:$0xff]  ;;  %v840_v54 = vld [vmem:[#allocation8 + $0x200] sm:$0xff] }
  0x98   : > { %1542 = vmatmul.mubr.msk.f32.gmra.mxu0 %vm511_vm1, %v410_v0  ;;  %908 = vmatprep.subr.mxu0 %v867_v27  ;;  %v903_v55 = vld [vmem:[#allocation8 + $0x3f8] sm:$0xff]  ;;  %v902_v56 = vld [vmem:[#allocation8 + $0x3f0] sm:$0xff]  ;;  %v901_v57 = vld [vmem:[#allocation8 + $0x3e8] sm:$0xff] }
  0x99   : > { %909 = vmatpush1.msra.mxu0 %v866_v28  ;;  %v900_v58 = vld [vmem:[#allocation8 + $0x3e0] sm:$0xff]  ;;  %v899_v59 = vld [vmem:[#allocation8 + $0x3d8] sm:$0xff]  ;;  %v898_v60 = vld [vmem:[#allocation8 + $0x3d0] sm:$0xff] }
  0x9a   : > { %910 = vmatprep.subr.mxu0 %v865_v29  ;;  %v897_v61 = vld [vmem:[#allocation8 + $0x3c8] sm:$0xff]  ;;  %v896_v0 = vld [vmem:[#allocation8 + $0x3c0] sm:$0xff]  ;;  %v895_v1 = vld [vmem:[#allocation8 + $0x3b8] sm:$0xff] }
  0x9b   : > { %911 = vmatpush1.msra.mxu0 %v864_v30  ;;  %v894_v4 = vld [vmem:[#allocation8 + $0x3b0] sm:$0xff]  ;;  %v893_v5 = vld [vmem:[#allocation8 + $0x3a8] sm:$0xff]  ;;  %v892_v8 = vld [vmem:[#allocation8 + $0x3a0] sm:$0xff] }
  0x9c   : > { %912 = vmatprep.subr.mxu0 %v863_v31  ;;  %v891_v9 = vld [vmem:[#allocation8 + $0x398] sm:$0xff]  ;;  %v890_v11 = vld [vmem:[#allocation8 + $0x390] sm:$0xff]  ;;  %v889_v13 = vld [vmem:[#allocation8 + $0x388] sm:$0xff] }
  0x9d   : > { %913 = vmatpush1.msra.mxu0 %v862_v32  ;;  %v888_v17 = vld [vmem:[#allocation8 + $0x380] sm:$0xff]  ;;  %v887_v20 = vld [vmem:[#allocation8 + $0x378] sm:$0xff]  ;;  %v885_v26 = vld [vmem:[#allocation8 + $0x368] sm:$0xff] }
  0x9e   : > { %914 = vmatprep.subr.mxu0 %v861_v33  ;;  %v411_v18 = vld [vmem:[%s2351_s3] sm:$0x3]  ;;  %v883_v33 = vld [vmem:[#allocation8 + $0x358] sm:$0xff]  ;;  %v792_v63 = vld [vmem:[#allocation8 + $0x88] sm:$0xff] }
  0x9f   : > { %915 = vmatpush1.msra.mxu0 %v860_v34  ;;  %v686_v24 = vrot.slane %v411_v18, %v685_v12  ;;  %v682_v28 = vrot.slane %v411_v18, %v681_v14  ;;  %v884_v31 = vld [vmem:[#allocation8 + $0x360] sm:$0xff]  ;;  %v778_v18 = vld [vmem:[#allocation8 + $0x18] sm:$0xff] }
  0xa0   : > { %916 = vmatprep.subr.mxu0 %v859_v35  ;;  %v882_v35 = vld [vmem:[#allocation8 + $0x350] sm:$0xff] }
  0xa1   : > { %917 = vmatpush1.msra.mxu0 %v858_v36 }
  0xa2   : > { %918 = vmatprep.subr.mxu0 %v857_v37 }
  0xa3   : > { %919 = vmatpush1.msra.mxu0 %v856_v38  ;;  %v881_v38 = vld [vmem:[#allocation8 + $0x348] sm:$0xff] }
  0xa4   : > { %920 = vmatprep.subr.mxu0 %v855_v39 }
  0xa5   : > { %921 = vmatpush1.msra.mxu0 %v854_v40  ;;  %v880_v40 = vld [vmem:[#allocation8 + $0x340] sm:$0xff] }
  0xa6   : > { %922 = vmatprep.subr.mxu0 %v853_v41 }
  0xa7   : > { %923 = vmatpush1.msra.mxu0 %v852_v42  ;;  %v879_v42 = vld [vmem:[#allocation8 + $0x338] sm:$0xff] }
  0xa8   : > { %924 = vmatprep.subr.mxu0 %v851_v43 }
  0xa9   : > { %925 = vmatpush1.msra.mxu0 %v850_v44  ;;  %v878_v44 = vld [vmem:[#allocation8 + $0x330] sm:$0xff] }
  0xaa   : > { %926 = vmatprep.subr.mxu0 %v849_v45 }
  0xab   : > { %927 = vmatpush1.msra.mxu0 %v848_v46  ;;  %v877_v46 = vld [vmem:[#allocation8 + $0x328] sm:$0xff] }
  0xac   : > { %928 = vmatprep.subr.mxu0 %v847_v47 }
  0xad   : > { %929 = vmatpush1.msra.mxu0 %v846_v48  ;;  %v806_v48 = vld [vmem:[#allocation8 + $0xf8] sm:$0xff] }
  0xae   : > { %930 = vmatprep.subr.mxu0 %v845_v49  ;;  %v805_v49 = vld [vmem:[#allocation8 + $0xf0] sm:$0xff] }
  0xaf   : > { %931 = vmatpush1.msra.mxu0 %v844_v50  ;;  %v804_v50 = vld [vmem:[#allocation8 + $0xe8] sm:$0xff] }
  0xb0   : > { %932 = vmatprep.subr.mxu0 %v843_v51  ;;  %v876_v51 = vld [vmem:[#allocation8 + $0x320] sm:$0xff] }
  0xb1   : > { %933 = vmatpush1.msra.mxu0 %v842_v52  ;;  %v803_v52 = vld [vmem:[#allocation8 + $0xe0] sm:$0xff] }
  0xb2   : > { %934 = vmatprep.subr.mxu0 %v841_v53  ;;  %v802_v53 = vld [vmem:[#allocation8 + $0xd8] sm:$0xff] }
  0xb3   : > { %935 = vmatpush1.msra.mxu0 %v840_v54  ;;  %v801_v54 = vld [vmem:[#allocation8 + $0xd0] sm:$0xff] }
  0xb4   : > { %936 = vmatprep.subr.mxu0 %v903_v55  ;;  %v800_v55 = vld [vmem:[#allocation8 + $0xc8] sm:$0xff] }
  0xb5   : > { %937 = vmatpush2.msra.mxu0 %v902_v56  ;;  %v799_v56 = vld [vmem:[#allocation8 + $0xc0] sm:$0xff] }
  0xb6   : > { %938 = vmatprep.subr.mxu0 %v901_v57  ;;  %v798_v57 = vld [vmem:[#allocation8 + $0xb8] sm:$0xff] }
  0xb7   : > { %939 = vmatpush2.msra.mxu0 %v900_v58  ;;  %v797_v58 = vld [vmem:[#allocation8 + $0xb0] sm:$0xff] }
  0xb8   : > { %940 = vmatprep.subr.mxu0 %v899_v59  ;;  %v796_v59 = vld [vmem:[#allocation8 + $0xa8] sm:$0xff] }
  0xb9   : > { %941 = vmatpush2.msra.mxu0 %v898_v60  ;;  %v795_v60 = vld [vmem:[#allocation8 + $0xa0] sm:$0xff] }
  0xba   : > { %942 = vmatprep.subr.mxu0 %v897_v61  ;;  %v794_v61 = vld [vmem:[#allocation8 + $0x98] sm:$0xff] }
  0xbb   : > { %943 = vmatpush2.msra.mxu0 %v896_v0  ;;  %v791_v0 = vld [vmem:[#allocation8 + $0x80] sm:$0xff] }
  0xbc   : > { %944 = vmatprep.subr.mxu0 %v895_v1  ;;  %v790_v1 = vld [vmem:[#allocation8 + $0x78] sm:$0xff] }
  0xbd   : > { %945 = vmatpush2.msra.mxu0 %v894_v4  ;;  %v789_v4 = vld [vmem:[#allocation8 + $0x70] sm:$0xff] }
  0xbe   : > { %946 = vmatprep.subr.mxu0 %v893_v5  ;;  %v788_v5 = vld [vmem:[#allocation8 + $0x68] sm:$0xff] }
  0xbf   : > { %947 = vmatpush2.msra.mxu0 %v892_v8  ;;  %v786_v8 = vld [vmem:[#allocation8 + $0x58] sm:$0xff] }
  0xc0   : > { %948 = vmatprep.subr.mxu0 %v891_v9  ;;  %v785_v9 = vld [vmem:[#allocation8 + $0x50] sm:$0xff] }
  0xc1   : > { %949 = vmatpush2.msra.mxu0 %v890_v11  ;;  %v783_v11 = vld [vmem:[#allocation8 + $0x40] sm:$0xff] }
  0xc2   : > { %950 = vmatprep.subr.mxu0 %v889_v13  ;;  %v782_v13 = vld [vmem:[#allocation8 + $0x38] sm:$0xff] }
  0xc3   : > { %951 = vmatpush2.msra.mxu0 %v888_v17  ;;  %v779_v17 = vld [vmem:[#allocation8 + $0x20] sm:$0xff] }
  0xc4   : > { %952 = vmatprep.subr.mxu0 %v887_v20  ;;  %v777_v20 = vld [vmem:[#allocation8 + $0x10] sm:$0xff] }
 0x14b   : > { %v1642_v21 = vpop.f32.mrf.mxu0 }
 0x14d   : > { %v485_v22 = vpop.f32.mrf.mxu0 }
 0x14e   : > { %1539 = vmatmul.mubr.msk.f32.vlgmr.msra.gmra.mxu1 %vm511_vm1, %v485_v22  ;;  %v886_v22 = vld [vmem:[#allocation8 + $0x370] sm:$0xff] }
 0x14f   : > { %588 = vmatprep.mubr.f32.mxu1 %v1953_v19  ;;  %953 = vmatpush2.msra.mxu0 %v886_v22  ;;  %v775_v22 = vld [vmem:[#allocation8] sm:$0xff] }
 0x150   : > { %954 = vmatprep.subr.mxu0 %v885_v26  ;;  %v835_v26 = vld [vmem:[#allocation8 + $0x1e0] sm:$0xff] }
 0x151   : > { %955 = vmatpush2.msra.mxu0 %v884_v31  ;;  %v830_v31 = vld [vmem:[#allocation8 + $0x1b8] sm:$0xff] }
 0x152   : > { %1540 = vmatmul.mubr.msk.f32.gmra.mxu1 %vm511_vm1, %v1642_v21  ;;  %956 = vmatprep.subr.mxu0 %v883_v33  ;;  %v828_v33 = vld [vmem:[#allocation8 + $0x1a8] sm:$0xff] }
 0x153   : > { %762 = vmatprep.mubr.f32.mxu1 %v1953_v19  ;;  %957 = vmatpush2.msra.mxu0 %v882_v35  ;;  %v827_v35 = vld [vmem:[#allocation8 + $0x1a0] sm:$0xff] }
 0x154   : > { %v667_v62 = vpop.f32.mrf.mxu0  ;;  %958 = vmatprep.subr.mxu0 %v881_v38  ;;  %v825_v38 = vld [vmem:[#allocation8 + $0x190] sm:$0xff] }
 0x155   : > { %959 = vmatpush2.msra.mxu0 %v880_v40  ;;  %v824_v40 = vld [vmem:[#allocation8 + $0x188] sm:$0xff] }
 0x156   : > { %v669_v7 = vpop.f32.mrf.mxu0  ;;  %960 = vmatprep.subr.mxu0 %v879_v42  ;;  %v823_v42 = vld [vmem:[#allocation8 + $0x180] sm:$0xff] }
 0x157   : > { %961 = vmatpush2.msra.mxu0 %v878_v44  ;;  %v822_v44 = vld [vmem:[#allocation8 + $0x178] sm:$0xff] }
 0x158   : > { %v673_v16 = vpop.f32.mrf.mxu0  ;;  %962 = vmatprep.subr.mxu0 %v877_v46  ;;  %v820_v46 = vld [vmem:[#allocation8 + $0x168] sm:$0xff] }
 0x159   : > { %963 = vmatpush2.msra.mxu0 %v876_v51  ;;  %v816_v51 = vld [vmem:[#allocation8 + $0x148] sm:$0xff] }
 0x15a   : > { %v675_v29 = vpop.f32.mrf.mxu0 }
 0x20e   : > { %v584_v10 = vpop.f32.mrf.mxu1 }
 0x20f   : > { %v668_v27 = vadd.f32 %v667_v62, %v584_v10  ;;  %v793_v62 = vld [vmem:[#allocation8 + $0x90] sm:$0xff]  ;;  %v784_v10 = vld [vmem:[#allocation8 + $0x48] sm:$0xff] }
 0x210   : > { %v586_v15 = vpop.f32.mrf.mxu1 }
 0x211   : > { %v670_v23 = vadd.f32 %v669_v7, %v586_v15  ;;  %v2239_v39 = vadd.f32 %v682_v28, %v668_v27  ;;  %v787_v7 = vld [vmem:[#allocation8 + $0x60] sm:$0xff]  ;;  %v781_v15 = vld [vmem:[#allocation8 + $0x30] sm:$0xff]  ;;  %v834_v27 = vld [vmem:[#allocation8 + $0x1d8] sm:$0xff] }
 0x212   : > { %v590_v21 = vpop.f32.mrf.mxu1 }
 0x213   : > { %v674_v25 = vadd.f32 %v673_v16, %v590_v21  ;;  %v690_v36 = vadd.f32 %v686_v24, %v670_v23  ;;  %v693_v47 = vmax.f32 %v2239_v39, 0.0  ;;  %v780_v16 = vld [vmem:[#allocation8 + $0x28] sm:$0xff]  ;;  %v838_v23 = vld [vmem:[#allocation8 + $0x1f8] sm:$0xff] }
 0x214   : > { %v592_v30 = vpop.f32.mrf.mxu1  ;;  %v776_v21 = vld [vmem:[#allocation8 + $0x8] sm:$0xff] }
 0x215   : > { %v676_v32 = vadd.f32 %v675_v29, %v592_v30  ;;  %v2235_v34 = vadd.f32 %v682_v28, %v674_v25  ;;  %v694_v45 = vmax.f32 %v690_v36, 0.0  ;;  %v836_v25 = vld [vmem:[#allocation8 + $0x1e8] sm:$0xff]  ;;  %v833_v28 = vld [vmem:[#allocation8 + $0x1d0] sm:$0xff]  ;;  %v831_v30 = vld [vmem:[#allocation8 + $0x1c0] sm:$0xff] }
 0x216   : > { %v832_v29 = vld [vmem:[#allocation8 + $0x1c8] sm:$0xff]  ;;  %v826_v36 = vld [vmem:[#allocation8 + $0x198] sm:$0xff] }
 0x217   : > { %v2237_v37 = vadd.f32 %v686_v24, %v676_v32  ;;  %v695_v43 = vmax.f32 %v2235_v34, 0.0  ;;  %v837_v24 = vld [vmem:[#allocation8 + $0x1f0] sm:$0xff]  ;;  %v1201_v34 = vld [vmem:[#allocation10 + $0x168] sm:$0xff] }
 0x218   : > { %v829_v32 = vld [vmem:[#allocation8 + $0x1b0] sm:$0xff] }
 0x219   : > { %v696_v41 = vmax.f32 %v2237_v37, 0.0  ;;  %v1219_v37 = vld [vmem:[#allocation10 + $0x1f8] sm:$0xff] }
 0x21b   : > { %726 = vmatprep.subr.mxu1 %v696_v41 }
 0x21c   : > { %727 = vmatpush1.msra.mxu1 %v695_v43 }
 0x21d   : > { %728 = vmatprep.subr.mxu1 %v694_v45 }
 0x21e   : > { %729 = vmatpush1.msra.mxu1 %v693_v47 }
 0x21f   : > { %1543 = vmatmul.mubr.msk.f32.vlgmr.msra.gmra.mxu1 %vm412_vm0, %v2211_v2  ;;  %981 = vmatprep.subr.mxu1 %v806_v48  ;;  %v819_v48 = vld [vmem:[#allocation8 + $0x160] sm:$0xff] }
 0x220   : > { %982 = vmatpush1.msra.mxu1 %v805_v49  ;;  %768 = vmatprep.mubr.f32.mxu1 %v1953_v19  ;;  %v818_v49 = vld [vmem:[#allocation8 + $0x158] sm:$0xff] }
 0x221   : > { %983 = vmatprep.subr.mxu1 %v804_v50  ;;  %v817_v50 = vld [vmem:[#allocation8 + $0x150] sm:$0xff] }
 0x222   : > { %984 = vmatpush1.msra.mxu1 %v803_v52  ;;  %v815_v52 = vld [vmem:[#allocation8 + $0x140] sm:$0xff] }
 0x223   : > { %1544 = vmatmul.mubr.msk.f32.gmra.mxu1 %vm412_vm0, %v2215_v3  ;;  %985 = vmatprep.subr.mxu1 %v802_v53  ;;  %v814_v53 = vld [vmem:[#allocation8 + $0x138] sm:$0xff] }
 0x224   : > { %986 = vmatpush1.msra.mxu1 %v801_v54  ;;  %1045 = vmatprep.mubr.f32.mxu1 %v694_v45  ;;  %v821_v45 = vld [vmem:[#allocation8 + $0x170] sm:$0xff] }
 0x225   : > { %987 = vmatprep.subr.mxu1 %v800_v55  ;;  %v813_v54 = vld [vmem:[#allocation8 + $0x130] sm:$0xff]  ;;  %v812_v55 = vld [vmem:[#allocation8 + $0x128] sm:$0xff] }
 0x226   : > { %988 = vmatpush1.msra.mxu1 %v799_v56  ;;  %v811_v56 = vld [vmem:[#allocation8 + $0x120] sm:$0xff] }
 0x227   : > { %989 = vmatprep.subr.mxu1 %v798_v57  ;;  %v810_v57 = vld [vmem:[#allocation8 + $0x118] sm:$0xff] }
 0x228   : > { %990 = vmatpush1.msra.mxu1 %v797_v58  ;;  %v809_v58 = vld [vmem:[#allocation8 + $0x110] sm:$0xff] }
 0x229   : > { %991 = vmatprep.subr.mxu1 %v796_v59  ;;  %v808_v59 = vld [vmem:[#allocation8 + $0x108] sm:$0xff] }
 0x22a   : > { %992 = vmatpush1.msra.mxu1 %v795_v60  ;;  %v807_v60 = vld [vmem:[#allocation8 + $0x100] sm:$0xff] }
 0x22b   : > { %993 = vmatprep.subr.mxu1 %v794_v61  ;;  %v875_v61 = vld [vmem:[#allocation8 + $0x318] sm:$0xff] }
 0x22c   : > { %994 = vmatpush1.msra.mxu1 %v793_v62  ;;  %964 = vmatprep.subr.mxu0 %v875_v61  ;;  %v874_v62 = vld [vmem:[#allocation8 + $0x310] sm:$0xff] }
 0x22d   : > { %995 = vmatprep.subr.mxu1 %v792_v63  ;;  %965 = vmatpush2.msra.mxu0 %v874_v62  ;;  %v873_v63 = vld [vmem:[#allocation8 + $0x308] sm:$0xff]  ;;  %v1185_v61 = vld [vmem:[#allocation10 + $0xf0] sm:$0xff] }
 0x22e   : > { %996 = vmatpush1.msra.mxu1 %v791_v0  ;;  %966 = vmatprep.subr.mxu0 %v873_v63  ;;  %v872_v0 = vld [vmem:[#allocation8 + $0x300] sm:$0xff]  ;;  %v1169_v62 = vld [vmem:[#allocation10 + $0x70] sm:$0xff]  ;;  %v1184_v63 = vld [vmem:[#allocation10 + $0xe8] sm:$0xff] }
 0x22f   : > { %997 = vmatprep.subr.mxu1 %v790_v1  ;;  %967 = vmatpush2.msra.mxu0 %v872_v0  ;;  %v1168_v0 = vld [vmem:[#allocation10 + $0x68] sm:$0xff] }
 0x230   : > { %998 = vmatpush1.msra.mxu1 %v789_v4 }
 0x231   : > { %999 = vmatprep.subr.mxu1 %v788_v5 }
 0x232   : > { %1000 = vmatpush1.msra.mxu1 %v787_v7  ;;  %v1202_v7 = vld [vmem:[#allocation10 + $0x170] sm:$0xff] }
 0x233   : > { %1001 = vmatprep.subr.mxu1 %v786_v8  ;;  %v1217_v8 = vld [vmem:[#allocation10 + $0x1e8] sm:$0xff] }
 0x234   : > { %1002 = vmatpush1.msra.mxu1 %v785_v9  ;;  %v1200_v9 = vld [vmem:[#allocation10 + $0x160] sm:$0xff] }
 0x235   : > { %1003 = vmatprep.subr.mxu1 %v784_v10  ;;  %v1215_v10 = vld [vmem:[#allocation10 + $0x1d8] sm:$0xff] }
 0x236   : > { %1004 = vmatpush1.msra.mxu1 %v783_v11  ;;  %v1199_v11 = vld [vmem:[#allocation10 + $0x158] sm:$0xff] }
 0x237   : > { %1005 = vmatprep.subr.mxu1 %v782_v13  ;;  %v1214_v13 = vld [vmem:[#allocation10 + $0x1d0] sm:$0xff] }
 0x238   : > { %1006 = vmatpush1.msra.mxu1 %v781_v15  ;;  %v1198_v15 = vld [vmem:[#allocation10 + $0x150] sm:$0xff] }
 0x239   : > { %1007 = vmatprep.subr.mxu1 %v780_v16  ;;  %v1213_v16 = vld [vmem:[#allocation10 + $0x1c8] sm:$0xff] }
 0x23a   : > { %1008 = vmatpush1.msra.mxu1 %v779_v17  ;;  %v1197_v17 = vld [vmem:[#allocation10 + $0x148] sm:$0xff] }
 0x23b   : > { %1009 = vmatprep.subr.mxu1 %v778_v18  ;;  %v1212_v18 = vld [vmem:[#allocation10 + $0x1c0] sm:$0xff] }
 0x23c   : > { %1010 = vmatpush1.msra.mxu1 %v777_v20  ;;  %v1196_v20 = vld [vmem:[#allocation10 + $0x140] sm:$0xff] }
 0x23d   : > { %1011 = vmatprep.subr.mxu1 %v776_v21  ;;  %v1211_v21 = vld [vmem:[#allocation10 + $0x1b8] sm:$0xff] }
 0x23e   : > { %1012 = vmatpush1.msra.mxu1 %v775_v22  ;;  %v1195_v22 = vld [vmem:[#allocation10 + $0x138] sm:$0xff] }
 0x23f   : > { %1013 = vmatprep.subr.mxu1 %v838_v23  ;;  %v1210_v23 = vld [vmem:[#allocation10 + $0x1b0] sm:$0xff] }
 0x240   : > { %1014 = vmatpush2.msra.mxu1 %v837_v24  ;;  %v1194_v24 = vld [vmem:[#allocation10 + $0x130] sm:$0xff] }
 0x241   : > { %1015 = vmatprep.subr.mxu1 %v836_v25  ;;  %v1209_v25 = vld [vmem:[#allocation10 + $0x1a8] sm:$0xff] }
 0x242   : > { %1016 = vmatpush2.msra.mxu1 %v835_v26  ;;  %v1193_v26 = vld [vmem:[#allocation10 + $0x128] sm:$0xff] }
 0x243   : > { %1017 = vmatprep.subr.mxu1 %v834_v27  ;;  %v1208_v27 = vld [vmem:[#allocation10 + $0x1a0] sm:$0xff] }
 0x244   : > { %1018 = vmatpush2.msra.mxu1 %v833_v28  ;;  %v1192_v28 = vld [vmem:[#allocation10 + $0x120] sm:$0xff] }
 0x245   : > { %1019 = vmatprep.subr.mxu1 %v832_v29  ;;  %v1207_v29 = vld [vmem:[#allocation10 + $0x198] sm:$0xff] }
 0x246   : > { %1020 = vmatpush2.msra.mxu1 %v831_v30  ;;  %v1191_v30 = vld [vmem:[#allocation10 + $0x118] sm:$0xff] }
 0x247   : > { %1021 = vmatprep.subr.mxu1 %v830_v31  ;;  %v1206_v31 = vld [vmem:[#allocation10 + $0x190] sm:$0xff] }
 0x248   : > { %1022 = vmatpush2.msra.mxu1 %v829_v32  ;;  %v1190_v32 = vld [vmem:[#allocation10 + $0x110] sm:$0xff] }
 0x249   : > { %1023 = vmatprep.subr.mxu1 %v828_v33 }
 0x24a   : > { %1024 = vmatpush2.msra.mxu1 %v827_v35 }
 0x24b   : > { %1025 = vmatprep.subr.mxu1 %v826_v36 }
 0x24c   : > { %1026 = vmatpush2.msra.mxu1 %v825_v38 }
 0x24d   : > { %1027 = vmatprep.subr.mxu1 %v824_v40 }
 0x24e   : > { %1028 = vmatpush2.msra.mxu1 %v823_v42  ;;  %v697_v42 = vld [vmem:[%s2353_s5] sm:$0x3] }
 0x24f   : > { %1029 = vmatprep.subr.mxu1 %v822_v44 }
 0x250   : > { %1030 = vmatpush2.msra.mxu1 %v821_v45 }
 0x251   : > { %1031 = vmatprep.subr.mxu1 %v820_v46  ;;  %v1066_v46 = vrot.slane %v697_v42, %v685_v12 }
 0x252   : > { %1032 = vmatpush2.msra.mxu1 %v819_v48 }
 0x253   : > { %1033 = vmatprep.subr.mxu1 %v818_v49 }
 0x254   : > { %1034 = vmatpush2.msra.mxu1 %v817_v50 }
 0x255   : > { %1035 = vmatprep.subr.mxu1 %v816_v51  ;;  %v1062_v51 = vrot.slane %v697_v42, %v681_v14  ;;  %v1186_v14 = vld [vmem:[#allocation10 + $0xf8] sm:$0xff] }
 0x256   : > { %1036 = vmatpush2.msra.mxu1 %v815_v52 }
 0x257   : > { %1037 = vmatprep.subr.mxu1 %v814_v53 }
 0x258   : > { %1038 = vmatpush2.msra.mxu1 %v813_v54 }
 0x259   : > { %1039 = vmatprep.subr.mxu1 %v812_v55 }
 0x25a   : > { %1040 = vmatpush2.msra.mxu1 %v811_v56 }
 0x25b   : > { %1041 = vmatprep.subr.mxu1 %v810_v57 }
 0x25c   : > { %1042 = vmatpush2.msra.mxu1 %v809_v58 }
 0x25d   : > { %1043 = vmatprep.subr.mxu1 %v808_v59 }
 0x25e   : > { %1044 = vmatpush2.msra.mxu1 %v807_v60  ;;  %v1170_v60 = vld [vmem:[#allocation10 + $0x78] sm:$0xff] }
 0x25f   : > { %1046 = vmatmul.mubr.f32.vlgmr.msra.gmra.mxu1 %v693_v47  ;;  %v1218_v47 = vld [vmem:[#allocation10 + $0x1f0] sm:$0xff]  ;;  %1560 = vmatprep.subr.mxu1 %v1219_v37 }
 0x260   : > { %1051 = vmatprep.mubr.f32.mxu1 %v696_v41  ;;  %v1203_v41 = vld [vmem:[#allocation10 + $0x178] sm:$0xff]  ;;  %v1165_v37 = vld [vmem:[#allocation10 + $0x50] sm:$0xff] }
 0x261   : > { %1561 = vmatpush3.msra.mxu1 %v1203_v41  ;;  %v1164_v41 = vld [vmem:[#allocation10 + $0x48] sm:$0xff] }
 0x262   : > { %1562 = vmatprep.subr.mxu1 %v1218_v47  ;;  %v1179_v47 = vld [vmem:[#allocation10 + $0xc0] sm:$0xff] }
 0x263   : > { %1052 = vmatmul.mubr.f32.gmra.mxu1 %v695_v43  ;;  %v1216_v43 = vld [vmem:[#allocation10 + $0x1e0] sm:$0xff] }
 0x264   : > { %1563 = vmatpush3.msra.mxu1 %v1202_v7  ;;  %v1163_v7 = vld [vmem:[#allocation10 + $0x40] sm:$0xff] }
 0x265   : > { %1564 = vmatprep.subr.mxu1 %v1217_v8  ;;  %v1162_v8 = vld [vmem:[#allocation10 + $0x38] sm:$0xff] }
 0x266   : > { %1565 = vmatpush3.msra.mxu1 %v1201_v34  ;;  %v1177_v34 = vld [vmem:[#allocation10 + $0xb0] sm:$0xff] }
 0x267   : > { %1566 = vmatprep.subr.mxu1 %v1216_v43  ;;  %v1161_v43 = vld [vmem:[#allocation10 + $0x30] sm:$0xff] }
 0x268   : > { %1567 = vmatpush3.msra.mxu1 %v1200_v9  ;;  %v1176_v9 = vld [vmem:[#allocation10 + $0xa8] sm:$0xff] }
 0x269   : > { %1568 = vmatprep.subr.mxu1 %v1215_v10  ;;  %v1160_v10 = vld [vmem:[#allocation10 + $0x28] sm:$0xff] }
 0x26a   : > { %1569 = vmatpush3.msra.mxu1 %v1199_v11  ;;  %v1175_v11 = vld [vmem:[#allocation10 + $0xa0] sm:$0xff] }
 0x26b   : > { %1570 = vmatprep.subr.mxu1 %v1214_v13  ;;  %v1159_v13 = vld [vmem:[#allocation10 + $0x20] sm:$0xff] }
 0x26c   : > { %1571 = vmatpush3.msra.mxu1 %v1198_v15  ;;  %v1174_v15 = vld [vmem:[#allocation10 + $0x98] sm:$0xff] }
 0x26d   : > { %1572 = vmatprep.subr.mxu1 %v1213_v16  ;;  %v1158_v16 = vld [vmem:[#allocation10 + $0x18] sm:$0xff] }
 0x26e   : > { %1573 = vmatpush3.msra.mxu1 %v1197_v17  ;;  %v1173_v17 = vld [vmem:[#allocation10 + $0x90] sm:$0xff] }
 0x26f   : > { %1574 = vmatprep.subr.mxu1 %v1212_v18  ;;  %v1157_v18 = vld [vmem:[#allocation10 + $0x10] sm:$0xff] }
 0x270   : > { %1575 = vmatpush3.msra.mxu1 %v1196_v20  ;;  %v1172_v20 = vld [vmem:[#allocation10 + $0x88] sm:$0xff] }
 0x271   : > { %1576 = vmatprep.subr.mxu1 %v1211_v21  ;;  %v1156_v21 = vld [vmem:[#allocation10 + $0x8] sm:$0xff] }
 0x272   : > { %1577 = vmatpush3.msra.mxu1 %v1195_v22  ;;  %v1171_v22 = vld [vmem:[#allocation10 + $0x80] sm:$0xff] }
 0x273   : > { %1578 = vmatprep.subr.mxu1 %v1210_v23  ;;  %v1155_v23 = vld [vmem:[#allocation10] sm:$0xff] }
 0x274   : > { %1579 = vmatpush3.msra.mxu1 %v1194_v24  ;;  %v1205_v24 = vld [vmem:[#allocation10 + $0x188] sm:$0xff] }
 0x275   : > { %1580 = vmatprep.subr.mxu1 %v1209_v25  ;;  %v1189_v25 = vld [vmem:[#allocation10 + $0x108] sm:$0xff] }
 0x276   : > { %1581 = vmatpush3.msra.mxu1 %v1193_v26  ;;  %v1204_v26 = vld [vmem:[#allocation10 + $0x180] sm:$0xff] }
 0x277   : > { %1582 = vmatprep.subr.mxu1 %v1208_v27  ;;  %v1188_v27 = vld [vmem:[#allocation10 + $0x100] sm:$0xff] }
 0x278   : > { %1583 = vmatpush3.msra.mxu1 %v1192_v28 }
 0x279   : > { %1584 = vmatprep.subr.mxu1 %v1207_v29 }
 0x27a   : > { %1585 = vmatpush3.msra.mxu1 %v1191_v30 }
 0x27b   : > { %1586 = vmatprep.subr.mxu1 %v1206_v31 }
 0x27c   : > { %1587 = vmatpush3.msra.mxu1 %v1190_v32 }
 0x27d   : > { %1588 = vmatprep.subr.mxu1 %v1205_v24 }
 0x27e   : > { %1589 = vmatpush3.msra.mxu1 %v1189_v25 }
 0x27f   : > { %1590 = vmatprep.subr.mxu1 %v1204_v26 }
 0x280   : > { %1591 = vmatpush3.msra.mxu1 %v1188_v27 }
 0x2df   : > { %v764_v1 = vpop.f32.mrf.mxu1 }
 0x2e1   : > { %v766_v4 = vpop.f32.mrf.mxu1 }
 0x2e2   : > { %968 = vmatprep.mubr.f32.mxu0 %v766_v4  ;;  %v1167_v4 = vld [vmem:[#allocation10 + $0x60] sm:$0xff] }
 0x2e3   : > { %v770_v5 = vpop.f32.mrf.mxu1  ;;  %969 = vmatmul.mubr.f32.vlgmr.msra.gmra.mxu0 %v764_v1  ;;  %v1183_v1 = vld [vmem:[#allocation10 + $0xe0] sm:$0xff] }
 0x2e5   : > { %v772_v39 = vpop.f32.mrf.mxu1 }
 0x2e6   : > { %974 = vmatprep.mubr.f32.mxu0 %v772_v39  ;;  %v1181_v39 = vld [vmem:[#allocation10 + $0xd0] sm:$0xff] }
 0x2e7   : > { %975 = vmatmul.mubr.f32.gmra.mxu0 %v770_v5  ;;  %v1182_v5 = vld [vmem:[#allocation10 + $0xd8] sm:$0xff] }
 0x2e8   : > { %1142 = vmatprep.mubr.f32.mxu0 %v1953_v19 }
 0x31f   : > { %v1047_v33 = vpop.f32.mrf.mxu1 }
 0x321   : > { %v1049_v35 = vpop.f32.mrf.mxu1 }
 0x323   : > { %v1053_v38 = vpop.f32.mrf.mxu1 }
 0x325   : > { %v1055_v49 = vpop.f32.mrf.mxu1 }
 0x3a3   : > { %v970_v36 = vpop.f32.mrf.mxu0 }
 0x3a4   : > { %v1048_v50 = vadd.f32 %v1047_v33, %v970_v36 }
 0x3a5   : > { %v972_v40 = vpop.f32.mrf.mxu0 }
 0x3a6   : > { %v1050_v45 = vadd.f32 %v1049_v35, %v972_v40  ;;  %v2273_v57 = vadd.f32 %v1062_v51, %v1048_v50 }
 0x3a7   : > { %v976_v44 = vpop.f32.mrf.mxu0 }
 0x3a8   : > { %v1054_v48 = vadd.f32 %v1053_v38, %v976_v44  ;;  %v1070_v55 = vadd.f32 %v1066_v46, %v1050_v45  ;;  %v1073_v6 = vmax.f32 %v2273_v57, 0.0  ;;  %v1547_v45 = vld [vmem:[%s2355_s7] ss:$0 sm:$0xff] }
 0x3a9   : > { %v978_v52 = vpop.f32.mrf.mxu0 }
 0x3aa   : > { %v1056_v53 = vadd.f32 %v1055_v49, %v978_v52  ;;  %v2269_v54 = vadd.f32 %v1062_v51, %v1054_v48  ;;  %v1074_v12 = vmax.f32 %v1070_v55, 0.0 }
 0x3ac   : > { %v2271_v56 = vadd.f32 %v1066_v46, %v1056_v53  ;;  %v1075_v59 = vmax.f32 %v2269_v54, 0.0 }
 0x3ae   : > { %v1076_v58 = vmax.f32 %v2271_v56, 0.0 }
 0x3b0   : > { %1106 = vmatprep.subr.mxu0 %v1076_v58 }
 0x3b1   : > { %1107 = vmatpush1.msra.mxu0 %v1075_v59 }
 0x3b2   : > { %1108 = vmatprep.subr.mxu0 %v1074_v12 }
 0x3b3   : > { %1109 = vmatpush1.msra.mxu0 %v1073_v6 }
 0x3b4   : > { %1545 = vmatmul.mubr.msk.f32.vlgmr.msra.gmra.mxu0 %vm412_vm0, %v2211_v2  ;;  %1598 = vmatprep.subr.mxu0 %v1186_v14  ;;  %v1166_v2 = vld [vmem:[#allocation10 + $0x58] sm:$0xff] }
 0x3b5   : > { %1599 = vmatpush3.msra.mxu0 %v1170_v60  ;;  %1148 = vmatprep.mubr.f32.mxu0 %v1953_v19  ;;  %v1180_v19 = vld [vmem:[#allocation10 + $0xc8] sm:$0xff] }
 0x3b6   : > { %1600 = vmatprep.subr.mxu0 %v1185_v61 }
 0x3b7   : > { %1601 = vmatpush3.msra.mxu0 %v1169_v62 }
 0x3b8   : > { %1546 = vmatmul.mubr.msk.f32.gmra.mxu0 %vm412_vm0, %v2215_v3  ;;  %1602 = vmatprep.subr.mxu0 %v1184_v63  ;;  %v1178_v3 = vld [vmem:[#allocation10 + $0xb8] sm:$0xff] }
 0x3b9   : > { %1603 = vmatpush3.msra.mxu0 %v1168_v0  ;;  %1359 = vmatprep.mubr.f32.mxu0 %v1074_v12 }
 0x3ba   : > { %1604 = vmatprep.subr.mxu0 %v1183_v1 }
 0x3bb   : > { %1605 = vmatpush3.msra.mxu0 %v1167_v4 }
 0x3bc   : > { %1606 = vmatprep.subr.mxu0 %v1182_v5 }
 0x3bd   : > { %1607 = vmatpush3.msra.mxu0 %v1166_v2 }
 0x3be   : > { %1608 = vmatprep.subr.mxu0 %v1181_v39 }
 0x3bf   : > { %1609 = vmatpush3.msra.mxu0 %v1165_v37 }
 0x3c0   : > { %1610 = vmatprep.subr.mxu0 %v1180_v19 }
 0x3c1   : > { %1611 = vmatpush3.msra.mxu0 %v1164_v41 }
 0x3c2   : > { %1612 = vmatprep.subr.mxu0 %v1179_v47 }
 0x3c3   : > { %1613 = vmatpush3.msra.mxu0 %v1163_v7 }
 0x3c4   : > { %1614 = vmatprep.subr.mxu0 %v1178_v3 }
 0x3c5   : > { %1615 = vmatpush3.msra.mxu0 %v1162_v8 }
 0x3c6   : > { %1616 = vmatprep.subr.mxu0 %v1177_v34 }
 0x3c7   : > { %1617 = vmatpush3.msra.mxu0 %v1161_v43 }
 0x3c8   : > { %1618 = vmatprep.subr.mxu0 %v1176_v9 }
 0x3c9   : > { %1619 = vmatpush3.msra.mxu0 %v1160_v10 }
 0x3ca   : > { %1620 = vmatprep.subr.mxu0 %v1175_v11 }
 0x3cb   : > { %1621 = vmatpush3.msra.mxu0 %v1159_v13 }
 0x3cc   : > { %1622 = vmatprep.subr.mxu0 %v1174_v15 }
 0x3cd   : > { %1623 = vmatpush3.msra.mxu0 %v1158_v16 }
 0x3ce   : > { %1624 = vmatprep.subr.mxu0 %v1173_v17 }
 0x3cf   : > { %1625 = vmatpush3.msra.mxu0 %v1157_v18 }
 0x3d0   : > { %1626 = vmatprep.subr.mxu0 %v1172_v20 }
 0x3d1   : > { %1627 = vmatpush3.msra.mxu0 %v1156_v21 }
 0x3d2   : > { %1628 = vmatprep.subr.mxu0 %v1171_v22 }
 0x3d3   : > { %1629 = vmatpush3.msra.mxu0 %v1155_v23 }
 0x3d4   : > { %1360 = vmatmul.mubr.f32.vlgmr.msra.gmra.mxu0 %v1073_v6 }
 0x3d5   : > { %1364 = vmatprep.mubr.f32.mxu0 %v1076_v58 }
 0x3d8   : > { %1365 = vmatmul.mubr.f32.gmra.mxu0 %v1075_v59 }
 0x474   : > { %v1144_v28 = vpop.f32.mrf.mxu0 }
 0x476   : > { %v1146_v29 = vpop.f32.mrf.mxu0 }
 0x477   : > { %1284 = vmatprep.mubr.f32.mxu1 %v1146_v29 }
 0x478   : > { %v1150_v30 = vpop.f32.mrf.mxu0  ;;  %1285 = vmatmul.mubr.f32.vlgmr.msra.gmra.mxu1 %v1144_v28 }
 0x47a   : > { %v1152_v31 = vpop.f32.mrf.mxu0 }
 0x47b   : > { %1289 = vmatprep.mubr.f32.mxu1 %v1152_v31 }
 0x47c   : > { %1290 = vmatmul.mubr.f32.gmra.mxu1 %v1150_v30 }
 0x494   : > { %v1630_v32 = vpop.f32.mrf.mxu0 }
 0x496   : > { %v1631_v33 = vpop.f32.mrf.mxu0 }
 0x497   : > { %v1632_v40 = vadd.f32 %v1631_v33, %v1630_v32 }
 0x498   : > { %v1633_v35 = vpop.f32.mrf.mxu0 }
 0x49a   : > { %v1634_v44 = vpop.f32.mrf.mxu0 }
 0x49b   : > { %v1635_v50 = vadd.f32 %v1634_v44, %v1633_v35 }
 0x538   : > { %v1592_v36 = vpop.f32.mrf.mxu1 }
 0x53a   : > { %v1593_v38 = vpop.f32.mrf.mxu1 }
 0x53b   : > { %v1594_v42 = vadd.f32 %v1593_v38, %v1592_v36 }
 0x53c   : > { %v1595_v46 = vpop.f32.mrf.mxu1 }
 0x53d   : > { %v1362_v48 = vadd.f32 %v1632_v40, %v1594_v42 }
 0x53e   : > { %v1596_v49 = vpop.f32.mrf.mxu1 }
 0x53f   : > { %v1376_v51 = vadd.f32 %v1547_v45, %v1362_v48  ;;  %v1597_v52 = vadd.f32 %v1596_v49, %v1595_v46 }
 0x541   : > { %1378 = vst [vmem:[%s406_s4] sm:$0xff] %v1376_v51  ;;  %v1367_v53 = vadd.f32 %v1635_v50, %v1597_v52 }
 0x543   : > { %v1377_v54 = vadd.f32 %v1547_v45, %v1367_v53 }
 0x545   : > { %1379 = vst [vmem:[%s406_s4 + $0x8] sm:$0xff] %v1377_v54 }
 0x546   : > { %1879 = shalt.err (!%p1876_p13)
}
 0x547   : > { %s1880_s13 = scalar_lea.hbm %s2305_s23, 256  ;;  %s1884_s11 = scalar_lea.hbm %s2356_s8, 512 }
 0x548   : > { %p1881_p6 = scmp.ne.s32.totalorder %s2305_s23, %s1880_s13  ;;  %p1885_p11 = scmp.lt.s32.totalorder %s2305_s23, %s2356_s8 }
 0x549   : > { %p1886_p4 = scmp.lt.s32.totalorder %s1884_s11, %s1880_s13 }
 0x54a   : > { %p1882_p1 = pnand %p1881_p6, %p2392_p5 }
 0x54b   : > { %p1887_p12 = por %p1886_p4, %p1885_p11 }
 0x54c   : > { %p1883_p8 = pneg %p1882_p1 }
 0x54e   : > { %p1888_p0 = pnand %p1887_p12, %p1883_p8 }
 0x550   : > { %1891 = shalt.err (!%p1888_p0)
}
 0x551   : > { %s1955_s10 = smov 128   ;;  %s1956_s21 = smov 8  }
 0x552   : > { %1659 = dma.vmem_to_hbm [thread:$0]  (%p2392_p5), %s2300_s18, 256, %s2305_s23, %s1381_s15, %s1955_s10, %s1955_s10, %s1956_s21  }
 0x553 PF: > { %s1409_s17 = sand.u32 1, %s1930_s27   ;;  %p2393_p3 = scmp.ne.s32.totalorder %s2373_s12, 0 }
 0x554   : > { %p2394_p7 = scmp.ge.s32.totalorder %s1942_s30, 2  ;;  %s1410_s4 = scalar_lea.sflag [#allocation4], %s1409_s17 }
 0x556   : > { %p1679_p9 = pnand %p2394_p7, %p2393_p3 }
 0x558   : > { %p1680_p2 = pneg %p1679_p9 }
 0x55a   : > { %1925 = dma.done.wait (%p1680_p2), %s1410_s4, 256  }
 0x55b   : > { %1927 = vsyncadd (%p1680_p2), %s1410_s4, 4294967040  ;;  %s2395_s30 = sld [smem:[#allocation18_spill]]  ;;  %s2398_s27 = smov %s1934_s28 }
 0x55c   : > { %s2396_s26 = sld [smem:[#allocation17_spill]] }
 0x55d   : > { %s2397_s29 = sld [smem:[#allocation19_spill]] }
 0x561   : > { %p25_p10 = scmp.ge.s32.totalorder %s2395_s30, 4  }
 0x562   : > { %s2399_s28 = smov %s2396_s26 }
 0x563   :  { %27 = sbr.rel (!%p25_p10) target bundleno = 13 (0xd), region = 125 }
 0x568   :  { %1415 = vsyncpa [#allocation3], 1 }
 0x569   :  { %1417 = vsyncpa [#allocation3 + $0x1], 1 }
 0x56a   :  { %1418 = vsyncpa [#allocation6], 1 }
 0x56b   :  { %1420 = vsyncpa [#allocation6 + $0x1], 1 }
 0x56c   :  { %1421 = vsyncpa [#allocation9], 1 }
 0x56d   :  { %1422 = vsyncpa [#allocation4], 1 }
 0x56e   :  { %1424 = vsyncpa [#allocation4 + $0x1], 1 }

</bundles_post_ra>
